<compile_context>
chip_gen: v6e
topology: v6e:2x2x1
jax: 0.10.0
libtpu: 0.0.40
codegen_flags: <defaults>
</compile_context>

<pallas_src>
import jax
import jax.numpy as jnp
from jax.experimental import pallas as pl
from jax.experimental.pallas import tpu as pltpu


def _round_up(x, m):
    return ((x + m - 1) // m) * m


def _fft_l1_kernel(pred_ref, gt_ref, fw_ref, gh_ref, out_ref, acc_ref):
    j = pl.program_id(1)

    @pl.when(j == 0)
    def _():
        acc_ref[...] = jnp.zeros_like(acc_ref)

    # Difference in the native input dtype; bf16 into the MXU.
    d = (pred_ref[...] - gt_ref[...]).astype(jnp.bfloat16)       # (TB, H, W)
    tb, h, w = d.shape

    # ---- Stage 1: W-DFT as ONE flat MXU matmul, M = TB*H ------------------
    #   a = d @ [Cw | Sw]  ->  [a_re | a_im] along the lane axis.
    a = jnp.dot(d.reshape(tb * h, w), fw_ref[...],
                preferred_element_type=jnp.float32)               # (TB*H, 2W) f32

    # Intrinsic relayout between the two DFT stages: fold H out of the rows so
    # stage 2 can also be one flat matmul.  Done as a batched minor-dims
    # transpose in f32 (XLU path), then a single downcast for the MXU.
    a3 = a.reshape(tb, h, 2 * w)                                  # free split
    a_t = jnp.swapaxes(a3, 1, 2).astype(jnp.bfloat16)             # (TB, 2W, H)

    # ---- Stage 2: H-DFT as ONE flat MXU matmul, M = TB*2W ------------------
    #   p = a_t @ [Ch | Sh]   (Ch, Sh are symmetric DFT factors)
    p = jnp.dot(a_t.reshape(tb * 2 * w, h), gh_ref[...],
                preferred_element_type=jnp.float32)               # (TB*2W, 2H) f32

    # Rows are ordered (tb, re/im-half, w'); columns are [Ch | Sh].
    p4 = p.reshape(tb, 2, w, 2 * h)                               # free split
    z_re = p4[:, 0, :, :h] - p4[:, 1, :, h:]                      # (TB, W, H)
    z_im = p4[:, 1, :, :h] + p4[:, 0, :, h:]                      # (TB, W, H)
    t = jnp.abs(z_re) + jnp.abs(z_im)                             # f32

    # Element-wise accumulate into VMEM scratch; no per-step scalar reduction.
    acc_ref[...] += jnp.sum(t, axis=0)                            # (W, H)

    # Final cross-lane reduction + lane-dense (8,128) store, once per half.
    @pl.when(j == pl.num_programs(1) - 1)
    def _():
        total = jnp.sum(acc_ref[...])
        out_ref[...] = jnp.broadcast_to(total, out_ref.shape).astype(out_ref.dtype)


def _dft_matrices(n):
    """Real/imag parts of the n-point DFT matrix exp(-2i*pi*p*q/n), float32."""
    k = jnp.arange(n, dtype=jnp.int32)
    # (p*q) mod n in integer arithmetic keeps the angle in [0, 2*pi) so cos/sin
    # stay accurate for large n.
    kk = jnp.mod(jnp.outer(k, k), n).astype(jnp.float32)
    phase = (2.0 * jnp.pi / n) * kk
    return jnp.cos(phase), -jnp.sin(phase)


def spa_fft_l1_loss(pred, gt, *, block_b=None):
    """Pallas implementation of LossNetwork.forward(pred, gt)."""
    assert pred.shape == gt.shape and pred.ndim == 4
    n, c, h, w = pred.shape
    b = n * c

    # Native dtype all the way into the kernel (feed bf16 directly if the
    # upstream activations are bf16 -> halves input DMA).
    pred_f = pred.reshape(b, h, w)
    gt_f = gt.reshape(b, h, w)
    in_itemsize = pred_f.dtype.itemsize

    # ---- tile sizing from a real per-step VMEM footprint --------------------
    try:
        vmem_cap = int(pltpu.get_tpu_info().vmem_capacity_bytes)
    except Exception:  # be conservative if the query is unavailable
        vmem_cap = 64 * 1024 * 1024
    vmem_budget = vmem_cap // 2

    half_b = pl.cdiv(b, 2)
    if block_b is None:
        # Target a stage-1 M dimension (TB*H) of >= 512 rows.
        block_b = _round_up(max(8, pl.cdiv(512, h)), 8)
    block_b = max(8, min(_round_up(block_b, 8), _round_up(half_b, 8)))

    def step_bytes(tb):
        inputs = 2 * 2 * tb * h * w * in_itemsize        # pred+gt, double-buffered
        consts = 2 * 2 * (w * 2 * w + h * 2 * h) * 2     # bf16 DFT factors, x2 bufs
        a_f32 = tb * h * 2 * w * 4                       # stage-1 output
        at_f32 = tb * h * 2 * w * 4                      # transposed copy
        at_b16 = tb * h * 2 * w * 2                      # bf16 matmul operand
        p_f32 = tb * 2 * w * 2 * h * 4                   # stage-2 output (largest)
        zs = 3 * tb * w * h * 4                          # z_re, z_im, |.| temp
        acc = w * h * 4
        return inputs + consts + a_f32 + at_f32 + at_b16 + p_f32 + zs + acc

    while block_b > 8 and step_bytes(block_b) > vmem_budget:
        block_b = max(8, _round_up(block_b // 2, 8))

    n_red = pl.cdiv(half_b, block_b)
    b_pad = 2 * block_b * n_red
    if b_pad != b:
        # Zero padding contributes nothing: fft2(pred - gt) of zeros is zero.
        pad = ((0, b_pad - b), (0, 0), (0, 0))
        pred_f = jnp.pad(pred_f, pad)
        gt_f = jnp.pad(gt_f, pad)

    # ---- DFT constants (bf16 for the MXU; f32 accumulation in-kernel) -------
    ch, sh = _dft_matrices(h)
    cw, sw = _dft_matrices(w)
    fw_cat = jnp.concatenate([cw, sw], axis=1).astype(jnp.bfloat16)   # (W, 2W)
    gh_cat = jnp.concatenate([ch, sh], axis=1).astype(jnp.bfloat16)   # (H, 2H)

    est = step_bytes(block_b)
    vmem_limit_bytes = int(min((vmem_cap * 7) // 8,
                               max(32 * 1024 * 1024, 2 * est)))

    # Advisory cost estimate so XLA schedules the surrounding graph sensibly.
    flops = int(4 * b_pad * h * w * (w + 2 * h))
    bytes_accessed = int(2 * b_pad * h * w * in_itemsize
                         + (w * 2 * w + h * 2 * h) * 2 + 2 * 8 * 128 * 4)
    cost = pl.CostEstimate(flops=flops, transcendentals=0,
                           bytes_accessed=bytes_accessed)

    grid_spec = pltpu.PrefetchScalarGridSpec(
        num_scalar_prefetch=0,
        grid=(2, n_red),
        in_specs=[
            pl.BlockSpec((block_b, h, w), lambda i, j: (i * n_red + j, 0, 0)),
            pl.BlockSpec((block_b, h, w), lambda i, j: (i * n_red + j, 0, 0)),
            pl.BlockSpec((w, 2 * w), lambda i, j: (0, 0)),
            pl.BlockSpec((h, 2 * h), lambda i, j: (0, 0)),
        ],
        out_specs=pl.BlockSpec((1, 8, 128), lambda i, j: (i, 0, 0)),
        scratch_shapes=[pltpu.VMEM((w, h), jnp.float32)],
    )

    partials = pl.pallas_call(
        _fft_l1_kernel,
        out_shape=jax.ShapeDtypeStruct((2, 8, 128), jnp.float32),
        grid_spec=grid_spec,
        compiler_params=pltpu.CompilerParams(
            dimension_semantics=("parallel", "arbitrary"),
            vmem_limit_bytes=vmem_limit_bytes),
        cost_estimate=cost,
    )(pred_f, gt_f, fw_cat, gh_cat)

    abs_total = partials[0, 0, 0] + partials[1, 0, 0]
    # L1Loss(reduction='mean') over the stacked (re, im) tensor: 2*N*C*H*W elems.
    return abs_total / (2.0 * n * c * h * w)


if __name__ == "__main__":
    key = jax.random.PRNGKey(0)
    k1, k2 = jax.random.split(key)
    # B = N*C = 32 -> grid (2 core-halves, 1 reduction step of TB=16 slices).
    N, C, H, W = 2, 16, 16, 16
    pred = jax.random.normal(k1, (N, C, H, W), dtype=jnp.float32)
    gt = jax.random.normal(k2, (N, C, H, W), dtype=jnp.float32)

    loss_fn = jax.jit(spa_fft_l1_loss)
    loss = loss_fn(pred, gt)
    jax.block_until_ready(loss)

    # Pure-JAX reference (jnp.fft.fft2 + L1 mean over stacked re/im).
    pf = jnp.fft.fft2(pred, axes=(-2, -1))
    gf = jnp.fft.fft2(gt, axes=(-2, -1))
    ref = jnp.mean(
        jnp.abs(jnp.stack((pf.real, pf.imag), -1)
                - jnp.stack((gf.real, gf.imag), -1)))
    # bf16 MXU operands (f32 accumulation) -> modest tolerance vs the f32 FFT.
    assert jnp.allclose(loss, ref, rtol=2e-2, atol=1e-3), (loss, ref)

    print("KERNEL_OK")
</pallas_src>

<mosaic_0001>
module attributes {stable_mosaic.version = 11 : i64} {
  func.func @_fft_l1_kernel(%arg0: i32, %arg1: i32, %arg2: memref<16x16x16xf32, #tpu.memory_space<vmem>>, %arg3: memref<16x16x16xf32, #tpu.memory_space<vmem>>, %arg4: memref<16x32xbf16, #tpu.memory_space<vmem>>, %arg5: memref<16x32xbf16, #tpu.memory_space<vmem>>, %arg6: memref<1x8x128xf32, #tpu.memory_space<vmem>>, %arg7: memref<16x16xf32, #tpu.memory_space<vmem>>) attributes {dimension_semantics = [#tpu.dimension_semantics<parallel>, #tpu.dimension_semantics<arbitrary>], iteration_bounds = array<i64: 2, 1>, scalar_prefetch = 0 : i64, scratch_operands = 1 : i64, tpu.core_type = #tpu.core_type<tc>, window_params = [{transform_indices = @transform_0, window_bounds = array<i64: 16, 16, 16>}, {transform_indices = @transform_1, window_bounds = array<i64: 16, 16, 16>}, {pipeline_mode = #tpu.pipeline_mode<synchronous>, transform_indices = @transform_2, window_bounds = array<i64: 16, 32>}, {pipeline_mode = #tpu.pipeline_mode<synchronous>, transform_indices = @transform_3, window_bounds = array<i64: 16, 32>}, {transform_indices = @transform_4, window_bounds = array<i64: 1, 8, 128>}]} {
    %c0_i32 = arith.constant 0 : i32
    %0 = arith.cmpi eq, %arg1, %c0_i32 : i32
    %1 = arith.extui %0 : i1 to i32
    %c0_i32_0 = arith.constant 0 : i32
    %2 = arith.cmpi ne, %1, %c0_i32_0 : i32
    scf.if %2 {
      %cst_18 = arith.constant 0.000000e+00 : f32
      %37 = vector.broadcast %cst_18 : f32 to vector<16x16xf32>
      %c0_19 = arith.constant 0 : index
      %c0_20 = arith.constant 0 : index
      %38 = vector.load %arg7[%c0_19, %c0_20] : memref<16x16xf32, #tpu.memory_space<vmem>>, vector<16x16xf32>
      tpu.vector_store %arg7[%c0_19, %c0_20], %37 {strides = array<i32>} : memref<16x16xf32, #tpu.memory_space<vmem>>, vector<16x16xf32>,
    } else {
    }
    %c0 = arith.constant 0 : index
    %c0_1 = arith.constant 0 : index
    %c0_2 = arith.constant 0 : index
    %3 = vector.load %arg2[%c0, %c0_1, %c0_2] : memref<16x16x16xf32, #tpu.memory_space<vmem>>, vector<16x16x16xf32>
    %c0_3 = arith.constant 0 : index
    %c0_4 = arith.constant 0 : index
    %c0_5 = arith.constant 0 : index
    %4 = vector.load %arg3[%c0_3, %c0_4, %c0_5] : memref<16x16x16xf32, #tpu.memory_space<vmem>>, vector<16x16x16xf32>
    %5 = arith.subf %3, %4 : vector<16x16x16xf32>
    %6 = arith.truncf %5 : vector<16x16x16xf32> to vector<16x16x16xbf16>
    %7 = vector.shape_cast %6 : vector<16x16x16xbf16> to vector<256x16xbf16>
    %c0_6 = arith.constant 0 : index
    %c0_7 = arith.constant 0 : index
    %8 = vector.load %arg4[%c0_6, %c0_7] : memref<16x32xbf16, #tpu.memory_space<vmem>>, vector<16x32xbf16>
    %cst = arith.constant dense<0.000000e+00> : vector<256x32xf32>
    %9 = tpu.matmul %7, %8, %cst {dimension_numbers = #tpu.dot_dimension_numbers<[1], [0], [0], [1], [0, 0, 1, 1], [], []>} : vector<256x16xbf16>, vector<16x32xbf16>, vector<256x32xf32> -> vector<256x32xf32>
    %10 = vector.shape_cast %9 : vector<256x32xf32> to vector<16x16x32xf32>
    %11 = tpu.transpose %10, [0, 2, 1] : vector<16x16x32xf32> -> vector<16x32x16xf32>
    %12 = arith.truncf %11 : vector<16x32x16xf32> to vector<16x32x16xbf16>
    %13 = vector.shape_cast %12 : vector<16x32x16xbf16> to vector<512x16xbf16>
    %c0_8 = arith.constant 0 : index
    %c0_9 = arith.constant 0 : index
    %14 = vector.load %arg5[%c0_8, %c0_9] : memref<16x32xbf16, #tpu.memory_space<vmem>>, vector<16x32xbf16>
    %cst_10 = arith.constant dense<0.000000e+00> : vector<512x32xf32>
    %15 = tpu.matmul %13, %14, %cst_10 {dimension_numbers = #tpu.dot_dimension_numbers<[1], [0], [0], [1], [0, 0, 1, 1], [], []>} : vector<512x16xbf16>, vector<16x32xbf16>, vector<512x32xf32> -> vector<512x32xf32>
    %16 = vector.shape_cast %15 : vector<512x32xf32> to vector<16x2x16x32xf32>
    %17 = vector.extract_strided_slice %16 {offsets = [0, 0, 0, 0], sizes = [16, 1, 16, 16], strides = [1, 1, 1, 1]} : vector<16x2x16x32xf32> to vector<16x1x16x16xf32>
    %18 = vector.shape_cast %17 : vector<16x1x16x16xf32> to vector<16x16x16xf32>
    %19 = vector.extract_strided_slice %16 {offsets = [0, 1, 0, 16], sizes = [16, 1, 16, 16], strides = [1, 1, 1, 1]} : vector<16x2x16x32xf32> to vector<16x1x16x16xf32>
    %20 = vector.shape_cast %19 : vector<16x1x16x16xf32> to vector<16x16x16xf32>
    %21 = arith.subf %18, %20 : vector<16x16x16xf32>
    %22 = vector.extract_strided_slice %16 {offsets = [0, 1, 0, 0], sizes = [16, 1, 16, 16], strides = [1, 1, 1, 1]} : vector<16x2x16x32xf32> to vector<16x1x16x16xf32>
    %23 = vector.shape_cast %22 : vector<16x1x16x16xf32> to vector<16x16x16xf32>
    %24 = vector.extract_strided_slice %16 {offsets = [0, 0, 0, 16], sizes = [16, 1, 16, 16], strides = [1, 1, 1, 1]} : vector<16x2x16x32xf32> to vector<16x1x16x16xf32>
    %25 = vector.shape_cast %24 : vector<16x1x16x16xf32> to vector<16x16x16xf32>
    %26 = arith.addf %23, %25 : vector<16x16x16xf32>
    %27 = math.absf %21 : vector<16x16x16xf32>
    %28 = math.absf %26 : vector<16x16x16xf32>
    %29 = arith.addf %27, %28 : vector<16x16x16xf32>
    %c0_11 = arith.constant 0 : index
    %c0_12 = arith.constant 0 : index
    %30 = vector.load %arg7[%c0_11, %c0_12] : memref<16x16xf32, #tpu.memory_space<vmem>>, vector<16x16xf32>
    %cst_13 = arith.constant dense<0.000000e+00> : vector<16x16xf32>
    %31 = vector.multi_reduction <add>, %29, %cst_13 [0] : vector<16x16x16xf32> to vector<16x16xf32>
    %32 = arith.addf %30, %31 : vector<16x16xf32>
    %c0_14 = arith.constant 0 : index
    %c0_15 = arith.constant 0 : index
    %33 = vector.load %arg7[%c0_14, %c0_15] : memref<16x16xf32, #tpu.memory_space<vmem>>, vector<16x16xf32>
    tpu.vector_store %arg7[%c0_14, %c0_15], %32 {strides = array<i32>} : memref<16x16xf32, #tpu.memory_space<vmem>>, vector<16x16xf32>,
    %c0_i32_16 = arith.constant 0 : i32
    %34 = arith.cmpi eq, %arg1, %c0_i32_16 : i32
    %35 = arith.extui %34 : i1 to i32
    %c0_i32_17 = arith.constant 0 : i32
    %36 = arith.cmpi ne, %35, %c0_i32_17 : i32
    scf.if %36 {
      %c0_18 = arith.constant 0 : index
      %c0_19 = arith.constant 0 : index
      %37 = vector.load %arg7[%c0_18, %c0_19] : memref<16x16xf32, #tpu.memory_space<vmem>>, vector<16x16xf32>
      %38 = vector.shape_cast %37 : vector<16x16xf32> to vector<1x16x16xf32>
      %cst_20 = arith.constant dense<0.000000e+00> : vector<1xf32>
      %39 = vector.multi_reduction <add>, %38, %cst_20 [1, 2] : vector<1x16x16xf32> to vector<1xf32>
      %40 = vector.shape_cast %39 : vector<1xf32> to vector<1x1x1xf32>
      %41 = vector.extract %40[0, 0, 0] : f32 from vector<1x1x1xf32>
      %42 = vector.broadcast %41 : f32 to vector<1x8x128xf32>
      %c0_21 = arith.constant 0 : index
      %c0_22 = arith.constant 0 : index
      %c0_23 = arith.constant 0 : index
      %43 = vector.load %arg6[%c0_21, %c0_22, %c0_23] : memref<1x8x128xf32, #tpu.memory_space<vmem>>, vector<1x8x128xf32>
      tpu.vector_store %arg6[%c0_21, %c0_22, %c0_23], %42 {strides = array<i32>} : memref<1x8x128xf32, #tpu.memory_space<vmem>>, vector<1x8x128xf32>,
    } else {
    }
    return
  }
  func.func @transform_0(%arg0: i32, %arg1: i32) -> (i32, i32, i32) {
    %c1_i32 = arith.constant 1 : i32
    %0 = arith.muli %arg0, %c1_i32 : i32
    %1 = arith.addi %0, %arg1 : i32
    %c0_i32 = arith.constant 0 : i32
    %c0_i32_0 = arith.constant 0 : i32
    %c0_i32_1 = arith.constant 0 : i32
    return %1, %c0_i32, %c0_i32_0 : i32, i32, i32
  }
  func.func @transform_1(%arg0: i32, %arg1: i32) -> (i32, i32, i32) {
    %c1_i32 = arith.constant 1 : i32
    %0 = arith.muli %arg0, %c1_i32 : i32
    %1 = arith.addi %0, %arg1 : i32
    %c0_i32 = arith.constant 0 : i32
    %c0_i32_0 = arith.constant 0 : i32
    %c0_i32_1 = arith.constant 0 : i32
    return %1, %c0_i32, %c0_i32_0 : i32, i32, i32
  }
  func.func @transform_2(%arg0: i32, %arg1: i32) -> (i32, i32) {
    %c0_i32 = arith.constant 0 : i32
    %c0_i32_0 = arith.constant 0 : i32
    %c0_i32_1 = arith.constant 0 : i32
    return %c0_i32, %c0_i32_0 : i32, i32
  }
  func.func @transform_3(%arg0: i32, %arg1: i32) -> (i32, i32) {
    %c0_i32 = arith.constant 0 : i32
    %c0_i32_0 = arith.constant 0 : i32
    %c0_i32_1 = arith.constant 0 : i32
    return %c0_i32, %c0_i32_0 : i32, i32
  }
  func.func @transform_4(%arg0: i32, %arg1: i32) -> (i32, i32, i32) {
    %c0_i32 = arith.constant 0 : i32
    %c0_i32_0 = arith.constant 0 : i32
    %c0_i32_1 = arith.constant 0 : i32
    return %arg0, %c0_i32, %c0_i32_0 : i32, i32, i32
  }
}

</mosaic_0001>

<bundles_post_ra>
// kernel: spa_fft_l1_loss.1
= control target key start
LH: loop header
LB: loop body
LE: loop exit
PB: predicated region body
PF: predicated region fallthrough
CT: control target
= control target key end

     0   :  { %9 = vsyncpa [#allocation4], 0  ;;  %s3368_s0 = inlined_call_operand.hbm [shape: f32[32,16,16], index: 0, kind: input, shape index: {}]   ;;  %s3369_s1 = inlined_call_operand.hbm [shape: f32[32,16,16], index: 1, kind: input, shape index: {}]   ;;  %s3370_s2 = inlined_call_operand.vmem [shape: bf16[16,32], index: 2, kind: input, shape index: {}, may-alias: {2,3}]   ;;  %s3371_s3 = inlined_call_operand.vmem [shape: bf16[16,32], index: 3, kind: input, shape index: {}, may-alias: {2,3}]   ;;  %s3372_s4 = inlined_call_operand.vmem [shape: f32[2,8,128], index: 4, kind: output, shape index: {}]  }
   0x1   :  { %11 = vsyncpa [#allocation4 + $0x1], 0 }
   0x2   :  { %12 = vsyncpa [#allocation6], 0 }
   0x3   :  { %14 = vsyncpa [#allocation6 + $0x1], 0  ;;  %s2735_s15 = smov 0   ;;  %s2737_s16 = smov 0  }
   0x4   :  { %s2739_s17 = smov 0   ;;  %s2741_s18 = smov 0  }
   0x5   :  { %s2743_s19 = smov 0   ;;  %s2745_s20 = smov 0  }
   0x6 LB: > { %s2156_s21 = sadd.s32 4294967295, %s2702_s20   ;;  %s32_s22 = sadd.s32 1, %s2698_s19  ;;  %s2702_s20 = sphi %s2745_s20, %s20_s20   ;;  %s2698_s19 = sphi %s2743_s19, %s3423_s19   ;;  %s2694_s18 = sphi %s2741_s18, %s3422_s18   ;;  %s2690_s17 = sphi %s2739_s17, %s3421_s17   ;;  %s2686_s16 = sphi %s2737_s16, %s3420_s16   ;;  %s2682_s15 = sphi %s2735_s15, %s3419_s15  }
   0x7   : > { %p34_p0 = scmp.ge.s32.totalorder %s32_s22, 2  ;;  %s41_s23 = sadd.s32 1, %s2690_s17 }
   0x8   : > { %p48_p1 = scmp.ne.s32.totalorder %s2690_s17, %s2686_s16  ;;  %p49_p2 = scmp.eq.s32.totalorder %s2702_s20, 0 }
   0x9   : > { %s3425_s22 = smov (%p34_p0, %s32_s22), 0  ;;  %p54_p4 = scmp.ne.s32.totalorder %s2686_s16, %s2682_s15 }
   0xa   : > { %p2771_p3 = por %p49_p2, %p48_p1  ;;  %s38_s25 = ssub.s32 %s2698_s19, %s3425_s22 }
   0xb   : > { %p55_p5 = scmp.eq.s32.totalorder %s2156_s21, 0  ;;  %p39_p6 = scmp.eq.s32.totalorder %s38_s25, 0 }
   0xc   : > { %p2393_p8 = scmp.lt.s32.totalorder %s2702_s20, 2  ;;  %s2787_s28 = sand.u32 1, %s2690_s17  }
   0xd   : > { %p2778_p7 = por %p55_p5, %p54_p4  ;;  %s2225_s29 = sshll.u32 %s2698_s19, 12 }
   0xe   : > { %s2784_s27 = scalar_select %p39_p6, %s2690_s17, %s41_s23  }
   0xf   : > { %s2160_s30 = sshll.u32 %s2787_s28, 8  ;;  %s192_s7 = scalar_lea.hbm %s3368_s0, %s2225_s29 }
  0x10   : > { %s184_s8 = scalar_lea.vmem [#allocation3], %s2160_s30  ;;  %p2798_p9 = pnand %p2393_p8, %p2771_p3 }
  0x11   : > { %s193_s9 = sshll.u32 %s184_s8, 4  ;;  %s181_s11 = scalar_lea.sflag [#allocation4], %s2787_s28  ;;  %s194_s9 = int_to_ptr.vmem [resolvable:$true] %s193_s9 }
  0x12   : > { %p2594_p10 = pneg %p2798_p9  ;;  %s2605_s12 = scalar_lea.vmem %s194_s9, 4096 }
  0x13   : > { %p2606_p11 = scmp.ne.s32.totalorder %s194_s9, %s2605_s12  ;;  %s2704_s13 = smov [#allocation3]  }
  0x14   : > { %s2610_s14 = sshll.u32 %s2704_s13, 4  ;;  %s2611_s14 = int_to_ptr.vmem [resolvable:$false] %s2610_s14 }
  0x15   : > { %p2608_p12 = pnand %p2606_p11, %p2594_p10  ;;  %s2612_s15 = scalar_lea.vmem %s2611_s14, 8192 }
  0x16   : > { %p2613_p0 = scmp.lt.s32.totalorder %s194_s9, %s2611_s14  ;;  %p2614_p1 = scmp.lt.s32.totalorder %s2612_s15, %s2605_s12 }
  0x17   : > { %p2609_p13 = pneg %p2608_p12 }
  0x18   : > { %p2615_p2 = por %p2614_p1, %p2613_p0 }
  0x1a   : > { %p2616_p3 = pnand %p2615_p2, %p2609_p13 }
  0x1c   : > { %2619 = shalt.err (!%p2616_p3)
}
  0x1d   : > { %s2705_s21 = smov 128   ;;  %s2706_s23 = smov 8  }
  0x1e   : > { %2389 = dma.hbm_to_vmem [thread:$0]  (!%p2798_p9), %s192_s7, 4096, %s194_s9, %s181_s11, %s2705_s21, %s2705_s21, %s2706_s23  }
  0x1f   : > { %p2168_p4 = scmp.ge.s32.totalorder %s2702_s20, 1  ;;  %p224_p5 = scmp.lt.s32.totalorder %s2702_s20, 3 }
  0x20   : > { %s215_s6 = scalar_lea.hbm %s3369_s1, %s2225_s29  ;;  %s207_s8 = scalar_lea.vmem [#allocation5], %s2160_s30 }
  0x21   : > { %p2812_p6 = pnand %p2168_p4, %p224_p5  ;;  %s216_s12 = sshll.u32 %s207_s8, 4  ;;  %s217_s12 = int_to_ptr.vmem [resolvable:$true] %s216_s12 }
  0x22   : > { %s204_s13 = scalar_lea.sflag [#allocation6], %s2787_s28  ;;  %s2633_s14 = scalar_lea.vmem %s217_s12, 4096 }
  0x23   : > { %p2634_p8 = scmp.ne.s32.totalorder %s217_s12, %s2633_s14  ;;  %s2707_s7 = smov [#allocation5]  }
  0x24   : > { %s2638_s9 = sshll.u32 %s2707_s7, 4  ;;  %s2639_s9 = int_to_ptr.vmem [resolvable:$false] %s2638_s9 }
  0x25   : > { %p2636_p11 = pnand %p2634_p8, %p2594_p10  ;;  %s2640_s11 = scalar_lea.vmem %s2639_s9, 8192 }
  0x26   : > { %p2641_p13 = scmp.lt.s32.totalorder %s217_s12, %s2639_s9  ;;  %p2642_p0 = scmp.lt.s32.totalorder %s2640_s11, %s2633_s14 }
  0x27   : > { %p2637_p12 = pneg %p2636_p11 }
  0x28   : > { %p2643_p1 = por %p2642_p0, %p2641_p13 }
  0x2a   : > { %p2644_p2 = pnand %p2643_p1, %p2637_p12 }
  0x2c   : > { %2647 = shalt.err (!%p2644_p2)
}
  0x2d   : > { %2392 = dma.hbm_to_vmem [thread:$0]  (!%p2798_p9), %s215_s6, 4096, %s217_s12, %s204_s13, %s2705_s21, %s2705_s21, %s2706_s23  }
  0x2e   : > { %228 = sbr.rel (%p2812_p6) target bundleno = 1097 (0x449), region = 36 }
  0x33   : > { %s230_s28 = sand.u32 1, %s2686_s16  }
  0x34   : > { %s2169_s29 = sshll.u32 %s230_s28, 8  ;;  %s231_s30 = scalar_lea.sflag [#allocation4], %s230_s28 }
  0x35   : > { %s2830_s15 = scalar_lea.vmem [#allocation3], %s2169_s29 }
  0x36   : > { %2673 = dma.done.wait (%p2778_p7), %s231_s30, 4096  }
  0x37   : > { %2675 = vsyncadd (%p2778_p7), %s231_s30, 4294963200  ;;  %s240_s25 = scalar_lea.sflag [#allocation6], %s230_s28  ;;  %s2836_s5 = scalar_lea.vmem [#allocation5], %s2169_s29 }
  0x38   : > { %2677 = dma.done.wait (%p2778_p7), %s240_s25, 4096  }
  0x39   : > { %2679 = vsyncadd (%p2778_p7), %s240_s25, 4294963200  ;;  %v2590_v0 = vld [vmem:[%s3370_s2] sm:$0xff]   ;;  %v288_v1 = vld [vmem:[%s2830_s15] sm:$0xff]  ;;  %vm285_vm0 = vcmask 130048   ;;  %s2708_s24 = smov 112   ;;  %p276_p7 = scmp.lt.s32.totalorder %s2694_s18, 1 }
  0x3a   : > { %v289_v2 = vld [vmem:[%s2830_s15 + $0x8] sm:$0xff]  ;;  %v320_v3 = vld [vmem:[%s2836_s5] sm:$0xff]  ;;  %2278 = vmatprep.subr.bf16.mxu0 %v2590_v0  ;;  %v290_v6 = vld [vmem:[%s2830_s15 + $0x10] sm:$0xff] }
  0x3b   : > { %v321_v4 = vld [vmem:[%s2836_s5 + $0x8] sm:$0xff]  ;;  %v352_v5 = vsub.f32 %v288_v1, %v320_v3  ;;  %v291_v7 = vld [vmem:[%s2830_s15 + $0x18] sm:$0xff]  ;;  %2279 = vmatpush3.bf16.msra.mxu0 %v2590_v0  ;;  %v322_v9 = vld [vmem:[%s2836_s5 + $0x10] sm:$0xff]  ;;  %s3427_s18 = smov (!%p276_p7, %s2694_s18), 1 }
  0x3c   : > { %v353_v8 = vsub.f32 %v289_v2, %v321_v4  ;;  %v323_v10 = vld [vmem:[%s2836_s5 + $0x18] sm:$0xff]  ;;  %v292_v11 = vld [vmem:[%s2830_s15 + $0x20] sm:$0xff]  ;;  %v354_v12 = vsub.f32 %v290_v6, %v322_v9  ;;  %v293_v14 = vld [vmem:[%s2830_s15 + $0x28] sm:$0xff]  ;;  %s2171_s6 = sshll.u32 %s3427_s18, 3 }
  0x3d   : > { %v355_v13 = vsub.f32 %v291_v7, %v323_v10  ;;  %v324_v15 = vld [vmem:[%s2836_s5 + $0x20] sm:$0xff]  ;;  %v325_v16 = vld [vmem:[%s2836_s5 + $0x28] sm:$0xff]  ;;  %v294_v20 = vld [vmem:[%s2830_s15 + $0x30] sm:$0xff]  ;;  %s279_s13 = scalar_lea.vmem %s3372_s4, %s2171_s6 }
  0x3e   : > { %v384_v17 = vpack.c.bf16 %v353_v8, %v352_v5  ;;  %v356_v18 = vsub.f32 %v292_v11, %v324_v15  ;;  %v357_v19 = vsub.f32 %v293_v14, %v325_v16  ;;  %v295_v21 = vld [vmem:[%s2830_s15 + $0x38] sm:$0xff]  ;;  %v326_v22 = vld [vmem:[%s2836_s5 + $0x30] sm:$0xff]  ;;  %v296_v25 = vld [vmem:[%s2830_s15 + $0x40] sm:$0xff] }
  0x3f   : > { %v385_v23 = vpack.c.bf16 %v355_v13, %v354_v12  ;;  %v327_v24 = vld [vmem:[%s2836_s5 + $0x38] sm:$0xff]  ;;  %v297_v26 = vld [vmem:[%s2830_s15 + $0x48] sm:$0xff]  ;;  %v328_v28 = vld [vmem:[%s2836_s5 + $0x40] sm:$0xff]  ;;  %v358_v30 = vsub.f32 %v294_v20, %v326_v22 }
  0x40   : > { %2280 = vmatprep.mubr.msk.bf16.mxu0 %vm285_vm0, %v384_v17  ;;  %v386_v27 = vpack.c.bf16 %v357_v19, %v356_v18  ;;  %v329_v29 = vld [vmem:[%s2836_s5 + $0x48] sm:$0xff]  ;;  %v359_v31 = vsub.f32 %v295_v21, %v327_v24  ;;  %v360_v32 = vsub.f32 %v296_v25, %v328_v28  ;;  %v298_v35 = vld [vmem:[%s2830_s15 + $0x50] sm:$0xff]  ;;  %v299_v36 = vld [vmem:[%s2830_s15 + $0x58] sm:$0xff] }
  0x41   : > { %2281 = vmatmul.mubr.msk.bf16.vlgmr.msra.gmra.mxu0 %vm285_vm0, %v385_v23  ;;  %v361_v33 = vsub.f32 %v297_v26, %v329_v29  ;;  %v330_v38 = vld [vmem:[%s2836_s5 + $0x50] sm:$0xff]  ;;  %v331_v39 = vld [vmem:[%s2836_s5 + $0x58] sm:$0xff]  ;;  %v300_v40 = vld [vmem:[%s2830_s15 + $0x60] sm:$0xff] }
  0x42   : > { %2284 = vmatprep.mubr.msk.bf16.mxu0 %vm285_vm0, %v386_v27  ;;  %v387_v34 = vpack.c.bf16 %v359_v31, %v358_v30  ;;  %v301_v41 = vld [vmem:[%s2830_s15 + $0x68] sm:$0xff]  ;;  %v332_v42 = vld [vmem:[%s2836_s5 + $0x60] sm:$0xff]  ;;  %v362_v44 = vsub.f32 %v298_v35, %v330_v38  ;;  %v363_v45 = vsub.f32 %v299_v36, %v331_v39  ;;  %v302_v48 = vld [vmem:[%s2830_s15 + $0x70] sm:$0xff] }
  0x43   : > { %v388_v37 = vpack.c.bf16 %v361_v33, %v360_v32  ;;  %v333_v43 = vld [vmem:[%s2836_s5 + $0x68] sm:$0xff]  ;;  %v364_v46 = vsub.f32 %v300_v40, %v332_v42  ;;  %v303_v50 = vld [vmem:[%s2830_s15 + $0x78] sm:$0xff]  ;;  %v334_v51 = vld [vmem:[%s2836_s5 + $0x70] sm:$0xff] }
  0x44   : > { %v365_v47 = vsub.f32 %v301_v41, %v333_v43  ;;  %v389_v49 = vpack.c.bf16 %v363_v45, %v362_v44  ;;  %v335_v52 = vld [vmem:[%s2836_s5 + $0x78] sm:$0xff]  ;;  %v304_v54 = vld [vmem:[%s2830_s15 + $0x80] sm:$0xff]  ;;  %v305_v55 = vld [vmem:[%s2830_s15 + $0x88] sm:$0xff]  ;;  %v366_v58 = vsub.f32 %v302_v48, %v334_v51 }
  0x45   : > { %v336_v56 = vld [vmem:[%s2836_s5 + $0x80] sm:$0xff]  ;;  %v337_v57 = vld [vmem:[%s2836_s5 + $0x88] sm:$0xff]  ;;  %v367_v59 = vsub.f32 %v303_v50, %v335_v52  ;;  %v306_v63 = vld [vmem:[%s2830_s15 + $0x90] sm:$0xff] }
  0x46   : > { %v390_v53 = vpack.c.bf16 %v365_v47, %v364_v46  ;;  %v368_v60 = vsub.f32 %v304_v54, %v336_v56  ;;  %v369_v61 = vsub.f32 %v305_v55, %v337_v57  ;;  %v307_v0 = vld [vmem:[%s2830_s15 + $0x98] sm:$0xff]  ;;  %v338_v2 = vld [vmem:[%s2836_s5 + $0x90] sm:$0xff]  ;;  %v308_v4 = vld [vmem:[%s2830_s15 + $0xa0] sm:$0xff] }
  0x47   : > { %v391_v62 = vpack.c.bf16 %v367_v59, %v366_v58  ;;  %v339_v3 = vld [vmem:[%s2836_s5 + $0x98] sm:$0xff]  ;;  %v309_v5 = vld [vmem:[%s2830_s15 + $0xa8] sm:$0xff]  ;;  %v340_v6 = vld [vmem:[%s2836_s5 + $0xa0] sm:$0xff]  ;;  %v370_v8 = vsub.f32 %v306_v63, %v338_v2 }
  0x48   : > { %v392_v1 = vpack.c.bf16 %v369_v61, %v368_v60  ;;  %v341_v7 = vld [vmem:[%s2836_s5 + $0xa8] sm:$0xff]  ;;  %v371_v9 = vsub.f32 %v307_v0, %v339_v3  ;;  %v372_v10 = vsub.f32 %v308_v4, %v340_v6  ;;  %v310_v13 = vld [vmem:[%s2830_s15 + $0xb0] sm:$0xff]  ;;  %v311_v14 = vld [vmem:[%s2830_s15 + $0xb8] sm:$0xff] }
  0x49   : > { %2285 = vmatmul.mubr.msk.bf16.gmra.mxu0 %vm285_vm0, %v387_v34  ;;  %v373_v11 = vsub.f32 %v309_v5, %v341_v7  ;;  %v342_v16 = vld [vmem:[%s2836_s5 + $0xb0] sm:$0xff]  ;;  %v343_v17 = vld [vmem:[%s2836_s5 + $0xb8] sm:$0xff]  ;;  %v312_v18 = vld [vmem:[%s2830_s15 + $0xc0] sm:$0xff] }
  0x4a   : > { %2288 = vmatprep.mubr.msk.bf16.mxu0 %vm285_vm0, %v388_v37  ;;  %v393_v12 = vpack.c.bf16 %v371_v9, %v370_v8  ;;  %v313_v19 = vld [vmem:[%s2830_s15 + $0xc8] sm:$0xff]  ;;  %v344_v20 = vld [vmem:[%s2836_s5 + $0xc0] sm:$0xff]  ;;  %v374_v22 = vsub.f32 %v310_v13, %v342_v16  ;;  %v375_v23 = vsub.f32 %v311_v14, %v343_v17  ;;  %v314_v27 = vld [vmem:[%s2830_s15 + $0xd0] sm:$0xff] }
  0x4b   : > { %v394_v15 = vpack.c.bf16 %v373_v11, %v372_v10  ;;  %v345_v21 = vld [vmem:[%s2836_s5 + $0xc8] sm:$0xff]  ;;  %v376_v24 = vsub.f32 %v312_v18, %v344_v20  ;;  %v315_v28 = vld [vmem:[%s2830_s15 + $0xd8] sm:$0xff]  ;;  %v346_v30 = vld [vmem:[%s2836_s5 + $0xd0] sm:$0xff] }
  0x4c   : > { %v377_v25 = vsub.f32 %v313_v19, %v345_v21  ;;  %v395_v26 = vpack.c.bf16 %v375_v23, %v374_v22  ;;  %v347_v31 = vld [vmem:[%s2836_s5 + $0xd8] sm:$0xff]  ;;  %v316_v32 = vld [vmem:[%s2830_s15 + $0xe0] sm:$0xff]  ;;  %v317_v33 = vld [vmem:[%s2830_s15 + $0xe8] sm:$0xff]  ;;  %v378_v36 = vsub.f32 %v314_v27, %v346_v30 }
  0x4d   : > { %v348_v34 = vld [vmem:[%s2836_s5 + $0xe0] sm:$0xff]  ;;  %v349_v35 = vld [vmem:[%s2836_s5 + $0xe8] sm:$0xff]  ;;  %v379_v37 = vsub.f32 %v315_v28, %v347_v31  ;;  %v318_v41 = vld [vmem:[%s2830_s15 + $0xf0] sm:$0xff] }
  0x4e   : > { %v396_v29 = vpack.c.bf16 %v377_v25, %v376_v24  ;;  %v380_v38 = vsub.f32 %v316_v32, %v348_v34  ;;  %v381_v39 = vsub.f32 %v317_v33, %v349_v35  ;;  %v319_v43 = vld [vmem:[%s2830_s15 + $0xf8] sm:$0xff]  ;;  %v350_v44 = vld [vmem:[%s2836_s5 + $0xf0] sm:$0xff] }
  0x4f   : > { %v397_v40 = vpack.c.bf16 %v379_v37, %v378_v36  ;;  %v351_v45 = vld [vmem:[%s2836_s5 + $0xf8] sm:$0xff]  ;;  %v382_v46 = vsub.f32 %v318_v41, %v350_v44 }
  0x50   : > { %v398_v42 = vpack.c.bf16 %v381_v39, %v380_v38  ;;  %v383_v47 = vsub.f32 %v319_v43, %v351_v45 }
  0x51   : > { %2289 = vmatmul.mubr.msk.bf16.gmra.mxu0 %vm285_vm0, %v389_v49  ;;  %v2591_v49 = vld [vmem:[%s3371_s3] sm:$0xff]  }
  0x52   : > { %2292 = vmatprep.mubr.msk.bf16.mxu0 %vm285_vm0, %v390_v53  ;;  %v399_v48 = vpack.c.bf16 %v383_v47, %v382_v46  ;;  %2312 = vmatprep.subr.bf16.mxu0 %v2591_v49 }
  0x53   : > { %2378 = vmatprep.subr.bf16.mxu1 %v2591_v49  ;;  %2313 = vmatpush3.bf16.msra.mxu0 %v2591_v49 }
  0x54   : > { %2379 = vmatpush3.bf16.msra.mxu1 %v2591_v49 }
  0x59   : > { %2293 = vmatmul.mubr.msk.bf16.gmra.mxu0 %vm285_vm0, %v391_v62 }
  0x5a   : > { %2296 = vmatprep.mubr.msk.bf16.mxu0 %vm285_vm0, %v392_v1 }
  0x61   : > { %2297 = vmatmul.mubr.msk.bf16.gmra.mxu0 %vm285_vm0, %v393_v12 }
  0x62   : > { %2300 = vmatprep.mubr.msk.bf16.mxu0 %vm285_vm0, %v394_v15 }
  0x69   : > { %2301 = vmatmul.mubr.msk.bf16.gmra.mxu0 %vm285_vm0, %v395_v26 }
  0x6a   : > { %2304 = vmatprep.mubr.msk.bf16.mxu0 %vm285_vm0, %v396_v29 }
  0x71   : > { %2305 = vmatmul.mubr.msk.bf16.gmra.mxu0 %vm285_vm0, %v397_v40 }
  0x72   : > { %2308 = vmatprep.mubr.msk.bf16.mxu0 %vm285_vm0, %v398_v42 }
  0x79   : > { %2309 = vmatmul.mubr.msk.bf16.gmra.mxu0 %vm285_vm0, %v399_v48 }
 0x101   : > { %v2282_v50 = vpop.f32.mrf.mxu0 }
 0x103   : > { %v491_v51 = vpop.f32.mrf.mxu0 }
 0x105   : > { %v2283_v52 = vpop.f32.mrf.mxu0 }
 0x107   : > { %v494_v53 = vpop.f32.mrf.mxu0 }
 0x109   : > { %v2286_v54 = vpop.f32.mrf.mxu0 }
 0x10b   : > { %v507_v55 = vpop.f32.mrf.mxu0 }
 0x10d   : > { %v2287_v56 = vpop.f32.mrf.mxu0 }
 0x10f   : > { %v510_v57 = vpop.f32.mrf.mxu0 }
 0x111   : > { %v2290_v58 = vpop.f32.mrf.mxu0 }
 0x113   : > { %v523_v59 = vpop.f32.mrf.mxu0 }
 0x114   : > { %v2446_v60 = vpack.i.bf16 %v2290_v58, %v523_v59 }
 0x115   : > { %v2291_v61 = vpop.f32.mrf.mxu0 }
 0x116   : > { %2447 = vxpose.xlu0.b32.start [1/2] (short) (narrow) %v2446_v60, 32 }
 0x117   : > { %v526_v62 = vpop.f32.mrf.mxu0 }
 0x118   : > { %v2448_v63 = vpack.i.bf16 %v2291_v61, %v526_v62 }
 0x119   : > { %v2294_v0 = vpop.f32.mrf.mxu0 }
 0x11a   : > { %2449 = vxpose.xlu0.b32.end [2/2] (short) (narrow) %v2448_v63, 32 }
 0x11b   : > { %v539_v1 = vpop.f32.mrf.mxu0 }
 0x11c   : > { %v2470_v2 = vpack.i.bf16 %v2294_v0, %v539_v1 }
 0x11d   : > { %v2295_v3 = vpop.f32.mrf.mxu0 }
 0x11e   : > { %2471 = vxpose.xlu1.b32.start [1/2] (short) (narrow) %v2470_v2, 32 }
 0x11f   : > { %v542_v4 = vpop.f32.mrf.mxu0 }
 0x120   : > { %v2472_v5 = vpack.i.bf16 %v2295_v3, %v542_v4 }
 0x121   : > { %v2298_v6 = vpop.f32.mrf.mxu0 }
 0x122   : > { %2473 = vxpose.xlu1.b32.end [2/2] (short) (narrow) %v2472_v5, 32  ;;  %v2518_v12 = vpack.i.bf16 %v2282_v50, %v2298_v6 }
 0x123   : > { %v555_v7 = vpop.f32.mrf.mxu0 }
 0x124   : > { %v2494_v8 = vpack.i.bf16 %v491_v51, %v555_v7 }
 0x125   : > { %v2299_v9 = vpop.f32.mrf.mxu0 }
 0x126   : > { %2495 = vxpose.xlu0.b32.start [1/2] (short) (narrow) %v2494_v8, 32  ;;  %v2520_v15 = vpack.i.bf16 %v2283_v52, %v2299_v9 }
 0x127   : > { %v558_v10 = vpop.f32.mrf.mxu0 }
 0x128   : > { %v2496_v11 = vpack.i.bf16 %v494_v53, %v558_v10 }
 0x129   : > { %v2302_v13 = vpop.f32.mrf.mxu0 }
 0x12a   : > { %2497 = vxpose.xlu0.b32.end [2/2] (short) (narrow) %v2496_v11, 32  ;;  %v2566_v21 = vpack.i.bf16 %v2286_v54, %v2302_v13 }
 0x12b   : > { %2519 = vxpose.xlu1.b32.start [1/2] (short) (narrow) %v2518_v12, 32  ;;  %v571_v14 = vpop.f32.mrf.mxu0 }
 0x12c   : > { %v2542_v17 = vpack.i.bf16 %v507_v55, %v571_v14 }
 0x12d   : > { %v2303_v16 = vpop.f32.mrf.mxu0 }
 0x12e   : > { %v2568_v23 = vpack.i.bf16 %v2287_v56, %v2303_v16 }
 0x12f   : > { %2521 = vxpose.xlu1.b32.end [2/2] (short) (narrow) %v2520_v15, 32  ;;  %v574_v18 = vpop.f32.mrf.mxu0 }
 0x130   : > { %v2544_v20 = vpack.i.bf16 %v510_v57, %v574_v18 }
 0x131   : > { %v2306_v19 = vpop.f32.mrf.mxu0 }
 0x133   : > { %2543 = vxpose.xlu0.b32.start [1/2] (short) (narrow) %v2542_v17, 32  ;;  %v587_v22 = vpop.f32.mrf.mxu0 }
 0x135   : > { %v2307_v24 = vpop.f32.mrf.mxu0 }
 0x137   : > { %2545 = vxpose.xlu0.b32.end [2/2] (short) (narrow) %v2544_v20, 32  ;;  %v590_v25 = vpop.f32.mrf.mxu0 }
 0x138   : > { %2567 = vxpose.xlu1.b32.start [1/2] (short) (narrow) %v2566_v21, 32 }
 0x139   : > { %v2310_v26 = vpop.f32.mrf.mxu0 }
 0x13b   : > { %v603_v27 = vpop.f32.mrf.mxu0 }
 0x13c   : > { %2569 = vxpose.xlu1.b32.end [2/2] (short) (narrow) %v2568_v23, 32 }
 0x13d   : > { %v2311_v28 = vpop.f32.mrf.mxu0 }
 0x13f   : > { %v606_v29 = vpop.f32.mrf.mxu0 }
 0x140   : > { %1002 = vxpose.xlu0.b32.start [1/2] (short) (narrow) %v587_v22, 32 }
 0x144   : > { %1003 = vxpose.xlu0.b32.end [2/2] (short) (narrow) %v590_v25, 32 }
 0x145   : > { %1034 = vxpose.xlu1.b32.start [1/2] (short) (narrow) %v2306_v19, 32 }
 0x149   : > { %1035 = vxpose.xlu1.b32.end [2/2] (short) (narrow) %v2307_v24, 32 }
 0x14d   : > { %1066 = vxpose.xlu0.b32.start [1/2] (short) (narrow) %v603_v27, 32 }
 0x151   : > { %1067 = vxpose.xlu0.b32.end [2/2] (short) (narrow) %v606_v29, 32 }
 0x152   : > { %1098 = vxpose.xlu1.b32.start [1/2] (short) (narrow) %v2310_v26, 32 }
 0x156   : > { %1099 = vxpose.xlu1.b32.end [2/2] (short) (narrow) %v2311_v28, 32 }
 0x192   : > { %v2450_v30 = vpop.trf.xlu0 }
 0x193   : > { %v2451_v33 = vunpack.i.l.bf16 %v2450_v30  ;;  %v2454_v42 = vunpack.i.h.bf16 %v2450_v30 }
 0x196   : > { %v2455_v31 = vpop.trf.xlu0 }
 0x197   : > { %v2456_v32 = vunpack.i.l.bf16 %v2455_v31  ;;  %v2459_v37 = vunpack.i.h.bf16 %v2455_v31 }
 0x199   : > { %v1138_v34 = vpack.c.bf16 %v2456_v32, %v2451_v33  ;;  %v1140_v46 = vpack.c.bf16 %v2459_v37, %v2454_v42 }
 0x19a   : > { %v2460_v35 = vpop.trf.xlu0  ;;  %v2474_v36 = vpop.trf.xlu1 }
 0x19b   : > { %2330 = vmatprep.mubr.msk.bf16.mxu1 %vm285_vm0, %v1138_v34  ;;  %v2461_v40 = vunpack.i.l.bf16 %v2460_v35  ;;  %v2464_v51 = vunpack.i.h.bf16 %v2460_v35  ;;  %v2475_v52 = vunpack.i.l.bf16 %v2474_v36  ;;  %v2478_v61 = vunpack.i.h.bf16 %v2474_v36 }
 0x19e   : > { %v2465_v38 = vpop.trf.xlu0  ;;  %v2479_v39 = vpop.trf.xlu1 }
 0x19f   : > { %v2466_v41 = vunpack.i.l.bf16 %v2465_v38  ;;  %v2469_v47 = vunpack.i.h.bf16 %v2465_v38  ;;  %v2480_v48 = vunpack.i.l.bf16 %v2479_v39  ;;  %v2483_v62 = vunpack.i.h.bf16 %v2479_v39 }
 0x1a1   : > { %v1139_v43 = vpack.c.bf16 %v2466_v41, %v2461_v40  ;;  %v1141_v55 = vpack.c.bf16 %v2469_v47, %v2464_v51  ;;  %v1142_v59 = vpack.c.bf16 %v2480_v48, %v2475_v52  ;;  %v1144_v11 = vpack.c.bf16 %v2483_v62, %v2478_v61 }
 0x1a2   : > { %v2484_v44 = vpop.trf.xlu1  ;;  %v2498_v45 = vpop.trf.xlu0 }
 0x1a3   : > { %2331 = vmatmul.mubr.msk.bf16.vlgmr.msra.gmra.mxu1 %vm285_vm0, %v1139_v43  ;;  %v2502_v53 = vunpack.i.h.bf16 %v2498_v45  ;;  %v2485_v63 = vunpack.i.l.bf16 %v2484_v44  ;;  %v2488_v13 = vunpack.i.h.bf16 %v2484_v44  ;;  %v2499_v14 = vunpack.i.l.bf16 %v2498_v45 }
 0x1a4   : > { %2334 = vmatprep.mubr.msk.bf16.mxu1 %vm285_vm0, %v1140_v46 }
 0x1a6   : > { %v2489_v49 = vpop.trf.xlu1  ;;  %v2503_v50 = vpop.trf.xlu0 }
 0x1a7   : > { %v2507_v54 = vunpack.i.h.bf16 %v2503_v50  ;;  %v2490_v60 = vunpack.i.l.bf16 %v2489_v49  ;;  %v2493_v12 = vunpack.i.h.bf16 %v2489_v49  ;;  %v2504_v15 = vunpack.i.l.bf16 %v2503_v50 }
 0x1a9   : > { %v1130_v58 = vpack.c.bf16 %v2507_v54, %v2502_v53  ;;  %v1143_v6 = vpack.c.bf16 %v2490_v60, %v2485_v63  ;;  %v1145_v23 = vpack.c.bf16 %v2493_v12, %v2488_v13  ;;  %v1146_v27 = vpack.c.bf16 %v2504_v15, %v2499_v14 }
 0x1aa   : > { %v2522_v56 = vpop.trf.xlu1  ;;  %v2508_v57 = vpop.trf.xlu0 }
 0x1ab   : > { %2335 = vmatmul.mubr.msk.bf16.gmra.mxu1 %vm285_vm0, %v1141_v55  ;;  %2314 = vmatprep.mubr.msk.bf16.mxu0 %vm285_vm0, %v1130_v58  ;;  %v2526_v2 = vunpack.i.h.bf16 %v2522_v56  ;;  %v2512_v4 = vunpack.i.h.bf16 %v2508_v57  ;;  %v2523_v30 = vunpack.i.l.bf16 %v2522_v56  ;;  %v2509_v34 = vunpack.i.l.bf16 %v2508_v57 }
 0x1ac   : > { %2338 = vmatprep.mubr.msk.bf16.mxu1 %vm285_vm0, %v1142_v59 }
 0x1ae   : > { %v2527_v0 = vpop.trf.xlu1  ;;  %v2513_v1 = vpop.trf.xlu0 }
 0x1af   : > { %v2531_v3 = vunpack.i.h.bf16 %v2527_v0  ;;  %v2517_v5 = vunpack.i.h.bf16 %v2513_v1  ;;  %v2514_v28 = vunpack.i.l.bf16 %v2513_v1  ;;  %v2528_v31 = vunpack.i.l.bf16 %v2527_v0 }
 0x1b1   : > { %v1132_v7 = vpack.c.bf16 %v2531_v3, %v2526_v2  ;;  %v1131_v8 = vpack.c.bf16 %v2517_v5, %v2512_v4  ;;  %v1147_v38 = vpack.c.bf16 %v2514_v28, %v2509_v34  ;;  %v1148_v42 = vpack.c.bf16 %v2528_v31, %v2523_v30 }
 0x1b2   : > { %v2532_v9 = vpop.trf.xlu1  ;;  %v2546_v10 = vpop.trf.xlu0 }
 0x1b3   : > { %2339 = vmatmul.mubr.msk.bf16.gmra.mxu1 %vm285_vm0, %v1143_v6  ;;  %2315 = vmatmul.mubr.msk.bf16.vlgmr.msra.gmra.mxu0 %vm285_vm0, %v1131_v8  ;;  %v2536_v18 = vunpack.i.h.bf16 %v2532_v9  ;;  %v2550_v20 = vunpack.i.h.bf16 %v2546_v10  ;;  %v2533_v48 = vunpack.i.l.bf16 %v2532_v9  ;;  %v2547_v50 = vunpack.i.l.bf16 %v2546_v10 }
 0x1b4   : > { %2342 = vmatprep.mubr.msk.bf16.mxu1 %vm285_vm0, %v1144_v11  ;;  %2318 = vmatprep.mubr.msk.bf16.mxu0 %vm285_vm0, %v1132_v7 }
 0x1b6   : > { %v2537_v16 = vpop.trf.xlu1  ;;  %v2551_v17 = vpop.trf.xlu0 }
 0x1b7   : > { %v2541_v19 = vunpack.i.h.bf16 %v2537_v16  ;;  %v2555_v21 = vunpack.i.h.bf16 %v2551_v17  ;;  %v2538_v44 = vunpack.i.l.bf16 %v2537_v16  ;;  %v2552_v46 = vunpack.i.l.bf16 %v2551_v17 }
 0x1b9   : > { %v1133_v22 = vpack.c.bf16 %v2541_v19, %v2536_v18  ;;  %v1134_v26 = vpack.c.bf16 %v2555_v21, %v2550_v20  ;;  %v1149_v53 = vpack.c.bf16 %v2538_v44, %v2533_v48  ;;  %v1150_v54 = vpack.c.bf16 %v2552_v46, %v2547_v50 }
 0x1ba   : > { %v2570_v24 = vpop.trf.xlu1  ;;  %v2556_v25 = vpop.trf.xlu0 }
 0x1bb   : > { %2343 = vmatmul.mubr.msk.bf16.gmra.mxu1 %vm285_vm0, %v1145_v23  ;;  %2319 = vmatmul.mubr.msk.bf16.gmra.mxu0 %vm285_vm0, %v1133_v22  ;;  %v2574_v29 = vunpack.i.h.bf16 %v2570_v24  ;;  %v2560_v36 = vunpack.i.h.bf16 %v2556_v25  ;;  %v2571_v57 = vunpack.i.l.bf16 %v2570_v24  ;;  %v2557_v60 = vunpack.i.l.bf16 %v2556_v25 }
 0x1bc   : > { %2346 = vmatprep.mubr.msk.bf16.mxu1 %vm285_vm0, %v1146_v27  ;;  %2322 = vmatprep.mubr.msk.bf16.mxu0 %vm285_vm0, %v1134_v26 }
 0x1be   : > { %v2575_v32 = vpop.trf.xlu1  ;;  %v2561_v33 = vpop.trf.xlu0 }
 0x1bf   : > { %v2579_v35 = vunpack.i.h.bf16 %v2575_v32  ;;  %v2565_v37 = vunpack.i.h.bf16 %v2561_v33  ;;  %v2562_v56 = vunpack.i.l.bf16 %v2561_v33  ;;  %v2576_v58 = vunpack.i.l.bf16 %v2575_v32 }
 0x1c1   : > { %v1136_v39 = vpack.c.bf16 %v2579_v35, %v2574_v29  ;;  %v1135_v41 = vpack.c.bf16 %v2565_v37, %v2560_v36  ;;  %v1151_v62 = vpack.c.bf16 %v2562_v56, %v2557_v60  ;;  %v1152_v63 = vpack.c.bf16 %v2576_v58, %v2571_v57 }
 0x1c2   : > { %v2580_v40 = vpop.trf.xlu1  ;;  %v1018_v43 = vpop.trf.xlu0 }
 0x1c3   : > { %2347 = vmatmul.mubr.msk.bf16.gmra.mxu1 %vm285_vm0, %v1147_v38  ;;  %2323 = vmatmul.mubr.msk.bf16.gmra.mxu0 %vm285_vm0, %v1135_v41  ;;  %v2584_v45 = vunpack.i.h.bf16 %v2580_v40  ;;  %v2581_v1 = vunpack.i.l.bf16 %v2580_v40 }
 0x1c4   : > { %2350 = vmatprep.mubr.msk.bf16.mxu1 %vm285_vm0, %v1148_v42  ;;  %2326 = vmatprep.mubr.msk.bf16.mxu0 %vm285_vm0, %v1136_v39 }
 0x1c6   : > { %v2585_v47 = vpop.trf.xlu1  ;;  %v1019_v51 = vpop.trf.xlu0 }
 0x1c7   : > { %v2589_v49 = vunpack.i.h.bf16 %v2585_v47  ;;  %v2586_v2 = vunpack.i.l.bf16 %v2585_v47  ;;  %v1154_v4 = vpack.c.bf16 %v1019_v51, %v1018_v43 }
 0x1c9   : > { %v1137_v52 = vpack.c.bf16 %v2589_v49, %v2584_v45  ;;  %v1153_v5 = vpack.c.bf16 %v2586_v2, %v2581_v1 }
 0x1ca   : > { %v1050_v55 = vpop.trf.xlu1  ;;  %v1020_v59 = vpop.trf.xlu0 }
 0x1cb   : > { %2351 = vmatmul.mubr.msk.bf16.gmra.mxu1 %vm285_vm0, %v1149_v53  ;;  %2327 = vmatmul.mubr.msk.bf16.gmra.mxu0 %vm285_vm0, %v1137_v52 }
 0x1cc   : > { %2354 = vmatprep.mubr.msk.bf16.mxu1 %vm285_vm0, %v1150_v54 }
 0x1ce   : > { %v1051_v61 = vpop.trf.xlu1  ;;  %v1021_v0 = vpop.trf.xlu0 }
 0x1cf   : > { %v1155_v8 = vpack.c.bf16 %v1021_v0, %v1020_v59  ;;  %v1156_v9 = vpack.c.bf16 %v1051_v61, %v1050_v55 }
 0x1d2   : > { %v1052_v3 = vpop.trf.xlu1  ;;  %v1082_v6 = vpop.trf.xlu0 }
 0x1d3   : > { %2355 = vmatmul.mubr.msk.bf16.gmra.mxu1 %vm285_vm0, %v1151_v62 }
 0x1d4   : > { %2358 = vmatprep.mubr.msk.bf16.mxu1 %vm285_vm0, %v1152_v63 }
 0x1d6   : > { %v1053_v7 = vpop.trf.xlu1  ;;  %v1083_v10 = vpop.trf.xlu0 }
 0x1d7   : > { %v1157_v13 = vpack.c.bf16 %v1053_v7, %v1052_v3  ;;  %v1158_v14 = vpack.c.bf16 %v1083_v10, %v1082_v6 }
 0x1da   : > { %v1114_v11 = vpop.trf.xlu1  ;;  %v1084_v12 = vpop.trf.xlu0 }
 0x1db   : > { %2359 = vmatmul.mubr.msk.bf16.gmra.mxu1 %vm285_vm0, %v1153_v5 }
 0x1dc   : > { %2362 = vmatprep.mubr.msk.bf16.mxu1 %vm285_vm0, %v1154_v4 }
 0x1de   : > { %v1115_v15 = vpop.trf.xlu1  ;;  %v1085_v16 = vpop.trf.xlu0 }
 0x1df   : > { %v1159_v18 = vpack.c.bf16 %v1085_v16, %v1084_v12  ;;  %v1160_v19 = vpack.c.bf16 %v1115_v15, %v1114_v11 }
 0x1e2   : > { %v1116_v17 = vpop.trf.xlu1 }
 0x1e3   : > { %2363 = vmatmul.mubr.msk.bf16.gmra.mxu1 %vm285_vm0, %v1155_v8 }
 0x1e4   : > { %2366 = vmatprep.mubr.msk.bf16.mxu1 %vm285_vm0, %v1156_v9 }
 0x1e6   : > { %v1117_v20 = vpop.trf.xlu1 }
 0x1e7   : > { %v1161_v21 = vpack.c.bf16 %v1117_v20, %v1116_v17 }
 0x1eb   : > { %2367 = vmatmul.mubr.msk.bf16.gmra.mxu1 %vm285_vm0, %v1157_v13 }
 0x1ec   : > { %2370 = vmatprep.mubr.msk.bf16.mxu1 %vm285_vm0, %v1158_v14 }
 0x1f3   : > { %2371 = vmatmul.mubr.msk.bf16.gmra.mxu1 %vm285_vm0, %v1159_v18 }
 0x1f4   : > { %2374 = vmatprep.mubr.msk.bf16.mxu1 %vm285_vm0, %v1160_v19 }
 0x1fb   : > { %2375 = vmatmul.mubr.msk.bf16.gmra.mxu1 %vm285_vm0, %v1161_v21 }
 0x263   : > { %v2960_v22 = vpop.f32.mrf.mxu1 }
 0x265   : > { %v2962_v23 = vpop.f32.mrf.mxu1 }
 0x267   : > { %v2964_v24 = vpop.f32.mrf.mxu1 }
 0x269   : > { %v2966_v25 = vpop.f32.mrf.mxu1 }
 0x26b   : > { %v2968_v26 = vpop.f32.mrf.mxu1 }
 0x26d   : > { %v2970_v27 = vpop.f32.mrf.mxu1 }
 0x26f   : > { %v2972_v28 = vpop.f32.mrf.mxu1 }
 0x271   : > { %v2974_v29 = vpop.f32.mrf.mxu1 }
 0x273   : > { %v2976_v30 = vpop.f32.mrf.mxu1  ;;  %v2978_v31 = vpop.f32.mrf.mxu0 }
 0x274   : > { %1587 = vrot.lane.b32.xlu0 %v2978_v31, %s2708_s24 }
 0x275   : > { %v2982_v32 = vpop.f32.mrf.mxu1  ;;  %v2984_v33 = vpop.f32.mrf.mxu0 }
 0x276   : > { %1747 = vrot.lane.b32.xlu1 %v2984_v33, %s2708_s24 }
 0x277   : > { %v2988_v34 = vpop.f32.mrf.mxu1  ;;  %v2990_v35 = vpop.f32.mrf.mxu0 }
 0x279   : > { %v2992_v36 = vpop.f32.mrf.mxu1  ;;  %v2994_v37 = vpop.f32.mrf.mxu0 }
 0x27a   : > { %1589 = vrot.lane.b32.xlu1 %v2990_v35, %s2708_s24  ;;  %1749 = vrot.lane.b32.xlu0 %v2994_v37, %s2708_s24 }
 0x27b   : > { %v3000_v38 = vpop.f32.mrf.mxu1  ;;  %v3002_v39 = vpop.f32.mrf.mxu0 }
 0x27d   : > { %v3004_v40 = vpop.f32.mrf.mxu1  ;;  %v3006_v41 = vpop.f32.mrf.mxu0 }
 0x27e   : > { %1591 = vrot.lane.b32.xlu1 %v3002_v39, %s2708_s24 }
 0x27f   : > { %v3010_v42 = vpop.f32.mrf.mxu1  ;;  %v3012_v43 = vpop.f32.mrf.mxu0 }
 0x281   : > { %v3014_v44 = vpop.f32.mrf.mxu1  ;;  %v3016_v45 = vpop.f32.mrf.mxu0 }
 0x282   : > { %1751 = vrot.lane.b32.xlu1 %v3006_v41, %s2708_s24  ;;  %1753 = vrot.lane.b32.xlu0 %v3016_v45, %s2708_s24 }
 0x283   : > { %v3022_v46 = vpop.f32.mrf.mxu1  ;;  %v3024_v47 = vpop.f32.mrf.mxu0 }
 0x285   : > { %v3026_v48 = vpop.f32.mrf.mxu1  ;;  %v3028_v49 = vpop.f32.mrf.mxu0 }
 0x286   : > { %1593 = vrot.lane.b32.xlu1 %v3012_v43, %s2708_s24 }
 0x287   : > { %v3032_v50 = vpop.f32.mrf.mxu1  ;;  %v3034_v51 = vpop.f32.mrf.mxu0 }
 0x288   : > { %1597 = vrot.lane.b32.xlu0 %v3034_v51, %s2708_s24 }
 0x289   : > { %v3038_v52 = vpop.f32.mrf.mxu1  ;;  %v3044_v54 = vpop.f32.mrf.mxu0 }
 0x28a   : > { %1595 = vrot.lane.b32.xlu1 %v3024_v47, %s2708_s24 }
 0x28b   : > { %v3042_v53 = vpop.f32.mrf.mxu1  ;;  %v3052_v56 = vpop.f32.mrf.mxu0 }
 0x28c   : > { %1605 = vrot.lane.b32.xlu0 %v2964_v24, %s2708_s24 }
 0x28d   : > { %v3048_v55 = vpop.f32.mrf.mxu1  ;;  %v3060_v58 = vpop.f32.mrf.mxu0 }
 0x28e   : > { %1603 = vrot.lane.b32.xlu1 %v2960_v22, %s2708_s24 }
 0x28f   : > { %v3056_v57 = vpop.f32.mrf.mxu1  ;;  %v3068_v60 = vpop.f32.mrf.mxu0 }
 0x290   : > { %1757 = vrot.lane.b32.xlu0 %v3044_v54, %s2708_s24 }
 0x291   : > { %v3064_v59 = vpop.f32.mrf.mxu1  ;;  %v3082_v63 = vpop.f32.mrf.mxu0 }
 0x292   : > { %1755 = vrot.lane.b32.xlu1 %v3028_v49, %s2708_s24 }
 0x293   : > { %v3072_v61 = vpop.f32.mrf.mxu1 }
 0x294   : > { %1765 = vrot.lane.b32.xlu0 %v2966_v25, %s2708_s24 }
 0x295   : > { %v3078_v62 = vpop.f32.mrf.mxu1 }
 0x296   : > { %1763 = vrot.lane.b32.xlu1 %v2962_v23, %s2708_s24 }
 0x297   : > { %v3086_v0 = vpop.f32.mrf.mxu1 }
 0x298   : > { %1601 = vrot.lane.b32.xlu0 %v3068_v60, %s2708_s24 }
 0x299   : > { %v3092_v1 = vpop.f32.mrf.mxu1 }
 0x29a   : > { %1599 = vrot.lane.b32.xlu1 %v3052_v56, %s2708_s24 }
 0x29b   : > { %v3098_v2 = vpop.f32.mrf.mxu1 }
 0x29c   : > { %1609 = vrot.lane.b32.xlu0 %v2972_v28, %s2708_s24 }
 0x29d   : > { %v3104_v3 = vpop.f32.mrf.mxu1 }
 0x29e   : > { %1607 = vrot.lane.b32.xlu1 %v2968_v26, %s2708_s24 }
 0x29f   : > { %v3110_v4 = vpop.f32.mrf.mxu1 }
 0x2a0   : > { %1761 = vrot.lane.b32.xlu0 %v3082_v63, %s2708_s24 }
 0x2a1   : > { %v3116_v5 = vpop.f32.mrf.mxu1 }
 0x2a2   : > { %1759 = vrot.lane.b32.xlu1 %v3060_v58, %s2708_s24 }
 0x2a3   : > { %v3120_v6 = vpop.f32.mrf.mxu1 }
 0x2a4   : > { %1769 = vrot.lane.b32.xlu0 %v2974_v29, %s2708_s24  ;;  %3391 = vst [vmem:[#allocation9_spill] sm:$0xff] %v3120_v6 }
 0x2a5   : > { %v3126_v7 = vpop.f32.mrf.mxu1 }
 0x2a6   : > { %1767 = vrot.lane.b32.xlu1 %v2970_v27, %s2708_s24  ;;  %3392 = vst [vmem:[#allocation10_spill] sm:$0xff] %v3126_v7 }
 0x2a7   : > { %v3132_v8 = vpop.f32.mrf.mxu1 }
 0x2a8   : > { %1613 = vrot.lane.b32.xlu0 %v2988_v34, %s2708_s24 }
 0x2a9   : > { %v3138_v9 = vpop.f32.mrf.mxu1 }
 0x2aa   : > { %1611 = vrot.lane.b32.xlu1 %v2976_v30, %s2708_s24  ;;  %3393 = vst [vmem:[#allocation11_spill] sm:$0xff] %v3138_v9 }
 0x2ab   : > { %v3144_v10 = vpop.f32.mrf.mxu1 }
 0x2ac   : > { %1773 = vrot.lane.b32.xlu0 %v2992_v36, %s2708_s24  ;;  %3394 = vst [vmem:[#allocation12_spill] sm:$0xff] %v3144_v10 }
 0x2ad   : > { %v3150_v11 = vpop.f32.mrf.mxu1 }
 0x2ae   : > { %1771 = vrot.lane.b32.xlu1 %v2982_v32, %s2708_s24  ;;  %3395 = vst [vmem:[#allocation13_spill] sm:$0xff] %v3150_v11 }
 0x2af   : > { %v3156_v12 = vpop.f32.mrf.mxu1 }
 0x2b0   : > { %1617 = vrot.lane.b32.xlu0 %v3010_v42, %s2708_s24  ;;  %3396 = vst [vmem:[#allocation14_spill] sm:$0xff] %v3156_v12 }
 0x2b1   : > { %v3162_v13 = vpop.f32.mrf.mxu1 }
 0x2b2   : > { %1615 = vrot.lane.b32.xlu1 %v3000_v38, %s2708_s24  ;;  %3397 = vst [vmem:[#allocation15_spill] sm:$0xff] %v3162_v13 }
 0x2b3   : > { %v3168_v14 = vpop.f32.mrf.mxu1 }
 0x2b4   : > { %1777 = vrot.lane.b32.xlu0 %v3014_v44, %s2708_s24  ;;  %3398 = vst [vmem:[#allocation16_spill] sm:$0xff] %v3168_v14 }
 0x2b5   : > { %v3174_v15 = vpop.f32.mrf.mxu1 }
 0x2b6   : > { %1775 = vrot.lane.b32.xlu1 %v3004_v40, %s2708_s24  ;;  %3399 = vst [vmem:[#allocation17_spill] sm:$0xff] %v3174_v15 }
 0x2b7   : > { %v3180_v16 = vpop.f32.mrf.mxu1 }
 0x2b8   : > { %1621 = vrot.lane.b32.xlu0 %v3032_v50, %s2708_s24  ;;  %3400 = vst [vmem:[#allocation18_spill] sm:$0xff] %v3180_v16 }
 0x2b9   : > { %v3186_v17 = vpop.f32.mrf.mxu1 }
 0x2ba   : > { %1619 = vrot.lane.b32.xlu1 %v3022_v46, %s2708_s24  ;;  %3401 = vst [vmem:[#allocation19_spill] sm:$0xff] %v3186_v17 }
 0x2bb   : > { %v3192_v19 = vpop.f32.mrf.mxu1 }
 0x2bc   : > { %1781 = vrot.lane.b32.xlu0 %v3038_v52, %s2708_s24  ;;  %3402 = vst [vmem:[#allocation20_spill] sm:$0xff] %v3192_v19 }
 0x2be   : > { %1779 = vrot.lane.b32.xlu1 %v3026_v48, %s2708_s24 }
 0x2c0   : > { %1625 = vrot.lane.b32.xlu0 %v3056_v57, %s2708_s24 }
 0x2c2   : > { %1623 = vrot.lane.b32.xlu1 %v3042_v53, %s2708_s24 }
 0x2c4   : > { %1785 = vrot.lane.b32.xlu0 %v3064_v59, %s2708_s24 }
 0x2c6   : > { %1783 = vrot.lane.b32.xlu1 %v3048_v55, %s2708_s24 }
 0x2c8   : > { %1629 = vrot.lane.b32.xlu0 %v3086_v0, %s2708_s24 }
 0x2ca   : > { %1627 = vrot.lane.b32.xlu1 %v3072_v61, %s2708_s24 }
 0x2cc   : > { %1789 = vrot.lane.b32.xlu0 %v3092_v1, %s2708_s24 }
 0x2ce   : > { %1787 = vrot.lane.b32.xlu1 %v3078_v62, %s2708_s24 }
 0x2d0   : > { %1633 = vrot.lane.b32.xlu0 %v3110_v4, %s2708_s24 }
 0x2d2   : > { %1631 = vrot.lane.b32.xlu1 %v3098_v2, %s2708_s24 }
 0x2d4   : > { %1793 = vrot.lane.b32.xlu0 %v3116_v5, %s2708_s24 }
 0x2d6   : > { %1791 = vrot.lane.b32.xlu1 %v3104_v3, %s2708_s24 }
 0x2d8   : > { %1637 = vrot.lane.b32.xlu0 %v3132_v8, %s2708_s24 }
 0x2da   : > { %1635 = vrot.lane.b32.xlu1 %v3120_v6, %s2708_s24 }
 0x2dc   : > { %1797 = vrot.lane.b32.xlu0 %v3138_v9, %s2708_s24 }
 0x2de   : > { %1795 = vrot.lane.b32.xlu1 %v3126_v7, %s2708_s24  ;;  %v2709_v7 = vmov 0.0  }
 0x2df   : > { %287 = vst.msk [vmem:[#allocation2 + $0x8] sm:$0xff] %vm285_vm0, %v2709_v7  ;;  %286 = vst.msk [vmem:[#allocation2] sm:$0xff] %vm285_vm0, %v2709_v7 }
 0x2e0   : > { %1641 = vrot.lane.b32.xlu0 %v3156_v12, %s2708_s24 }
 0x2e2   : > { %1639 = vrot.lane.b32.xlu1 %v3144_v10, %s2708_s24 }
 0x2e4   : > { %1801 = vrot.lane.b32.xlu0 %v3162_v13, %s2708_s24  ;;  %v3202_v13 = vpop.f32.mrf.mxu1 }
 0x2e6   : > { %v1588_v18 = vpop.permute.xlu0 %1587  ;;  %1799 = vrot.lane.b32.xlu1 %v3150_v11, %s2708_s24 }
 0x2e7   : > { %v1683_v20 = vsub.f32 %v2984_v33, %v1588_v18 }
 0x2e8   : > { %v1748_v21 = vpop.permute.xlu1 %1747  ;;  %1645 = vrot.lane.b32.xlu0 %v3180_v16, %s2708_s24 }
 0x2e9   : > { %v1843_v10 = vadd.f32 %v2978_v31, %v1748_v21  ;;  %v1875_v11 = vand.u32 2147483647, %v1683_v20  ;;  %v3210_v31 = vpop.f32.mrf.mxu1 }
 0x2ea   : > { %1643 = vrot.lane.b32.xlu1 %v3168_v14, %s2708_s24  ;;  %3403 = vst [vmem:[#allocation21_spill] sm:$0xff] %v3210_v31 }
 0x2eb   : > { %v1907_v12 = vand.u32 2147483647, %v1843_v10 }
 0x2ec   : > { %v1590_v6 = vpop.permute.xlu1 %1589  ;;  %v1750_v33 = vpop.permute.xlu0 %1749  ;;  %1805 = vrot.lane.b32.xlu0 %v3186_v17, %s2708_s24 }
 0x2ed   : > { %v1939_v18 = vadd.f32 %v1907_v12, %v1875_v11  ;;  %v1684_v16 = vsub.f32 %v2994_v37, %v1590_v6  ;;  %v1844_v9 = vadd.f32 %v2990_v35, %v1750_v33  ;;  %v3216_v11 = vpop.f32.mrf.mxu1 }
 0x2ee   : > { %1803 = vrot.lane.b32.xlu1 %v3174_v15, %s2708_s24  ;;  %3404 = vst [vmem:[#allocation22_spill] sm:$0xff] %v3216_v11 }
 0x2ef   : > { %v1876_v7 = vand.u32 2147483647, %v1684_v16  ;;  %v1908_v21 = vand.u32 2147483647, %v1844_v9 }
 0x2f0   : > { %v1592_v14 = vpop.permute.xlu1 %1591  ;;  %1649 = vrot.lane.b32.xlu0 %v3210_v31, %s2708_s24 }
 0x2f1   : > { %v1940_v10 = vadd.f32 %v1908_v21, %v1876_v7  ;;  %v1685_v37 = vsub.f32 %v3006_v41, %v1592_v14  ;;  %v1973_v41 = vsel %vm285_vm0, %v1939_v18, 0.0 }
 0x2f2   : > { %1647 = vrot.lane.b32.xlu1 %v3192_v19, %s2708_s24 }
 0x2f3   : > { %v1877_v9 = vand.u32 2147483647, %v1685_v37  ;;  %v2004_v37 = vsel %vm285_vm0, %v1940_v10, 0.0 }
 0x2f4   : > { %v1752_v35 = vpop.permute.xlu1 %1751  ;;  %v1754_v6 = vpop.permute.xlu0 %1753  ;;  %1809 = vrot.lane.b32.xlu0 %v3216_v11, %s2708_s24 }
 0x2f5   : > { %v1845_v12 = vadd.f32 %v3002_v39, %v1752_v35  ;;  %v1846_v20 = vadd.f32 %v3012_v43, %v1754_v6 }
 0x2f6   : > { %1807 = vrot.lane.b32.xlu1 %v3202_v13, %s2708_s24 }
 0x2f7   : > { %v1909_v16 = vand.u32 2147483647, %v1845_v12  ;;  %v1910_v31 = vand.u32 2147483647, %v1846_v20 }
 0x2f8   : > { %v1594_v33 = vpop.permute.xlu1 %1593 }
 0x2f9   : > { %v1941_v7 = vadd.f32 %v1909_v16, %v1877_v9  ;;  %v1686_v21 = vsub.f32 %v3016_v45, %v1594_v33 }
 0x2fa   : > { %v1598_v19 = vpop.permute.xlu0 %1597 }
 0x2fb   : > { %v1974_v14 = vsel %vm285_vm0, %v1941_v7, 0.0  ;;  %v1878_v11 = vand.u32 2147483647, %v1686_v21  ;;  %v1688_v9 = vsub.f32 %v3044_v54, %v1598_v19 }
 0x2fc   : > { %v1975_v15 = vadd.f32 %v1974_v14, %v1973_v41  ;;  %v1596_v39 = vpop.permute.xlu1 %1595 }
 0x2fd   : > { %v1942_v35 = vadd.f32 %v1910_v31, %v1878_v11  ;;  %v1687_v45 = vsub.f32 %v3028_v49, %v1596_v39  ;;  %v1880_v7 = vand.u32 2147483647, %v1688_v9 }
 0x2fe   : > { %v1606_v17 = vpop.permute.xlu0 %1605 }
 0x2ff   : > { %v2005_v12 = vsel %vm285_vm0, %v1942_v35, 0.0  ;;  %v1692_v20 = vsub.f32 %v2966_v25, %v1606_v17  ;;  %v1879_v11 = vand.u32 2147483647, %v1687_v45 }
 0x300   : > { %v2006_v43 = vadd.f32 %v2005_v12, %v2004_v37  ;;  %v1604_v6 = vpop.permute.xlu1 %1603 }
 0x301   : > { %v1691_v41 = vsub.f32 %v2962_v23, %v1604_v6  ;;  %v1884_v19 = vand.u32 2147483647, %v1692_v20 }
 0x302   : > { %v1758_v16 = vpop.permute.xlu0 %1757 }
 0x303   : > { %v1848_v18 = vadd.f32 %v3034_v51, %v1758_v16  ;;  %v1883_v9 = vand.u32 2147483647, %v1691_v41 }
 0x304   : > { %v1756_v33 = vpop.permute.xlu1 %1755 }
 0x305   : > { %v1912_v21 = vand.u32 2147483647, %v1848_v18  ;;  %v1847_v31 = vadd.f32 %v3024_v47, %v1756_v33 }
 0x306   : > { %v1766_v10 = vpop.permute.xlu0 %1765 }
 0x307   : > { %v1944_v14 = vadd.f32 %v1912_v21, %v1880_v7  ;;  %v1911_v35 = vand.u32 2147483647, %v1847_v31  ;;  %v1852_v54 = vadd.f32 %v2964_v24, %v1766_v10 }
 0x308   : > { %v1764_v49 = vpop.permute.xlu1 %1763 }
 0x309   : > { %v2007_v39 = vsel %vm285_vm0, %v1944_v14, 0.0  ;;  %v1943_v51 = vadd.f32 %v1911_v35, %v1879_v11  ;;  %v1916_v37 = vand.u32 2147483647, %v1852_v54  ;;  %v1851_v25 = vadd.f32 %v2960_v22, %v1764_v49 }
 0x30a   : > { %v2008_v17 = vadd.f32 %v2007_v39, %v2006_v43  ;;  %v1602_v12 = vpop.permute.xlu0 %1601 }
 0x30b   : > { %v1976_v47 = vsel %vm285_vm0, %v1943_v51, 0.0  ;;  %v1948_v45 = vadd.f32 %v1916_v37, %v1884_v19  ;;  %v1915_v16 = vand.u32 2147483647, %v1851_v25  ;;  %v1690_v20 = vsub.f32 %v3082_v63, %v1602_v12 }
 0x30c   : > { %v1977_v23 = vadd.f32 %v1976_v47, %v1975_v15  ;;  %v1600_v6 = vpop.permute.xlu1 %1599 }
 0x30d   : > { %v1947_v18 = vadd.f32 %v1915_v16, %v1883_v9  ;;  %v1689_v7 = vsub.f32 %v3060_v58, %v1600_v6  ;;  %v1882_v11 = vand.u32 2147483647, %v1690_v20  ;;  %v2011_v37 = vsel %vm285_vm0, %v1948_v45, 0.0 }
 0x30e   : > { %v1610_v33 = vpop.permute.xlu0 %1609 }
 0x30f   : > { %v1694_v22 = vsub.f32 %v2974_v29, %v1610_v33  ;;  %v1881_v14 = vand.u32 2147483647, %v1689_v7  ;;  %v1980_v33 = vsel %vm285_vm0, %v1947_v18, 0.0 }
 0x310   : > { %v1608_v24 = vpop.permute.xlu1 %1607 }
 0x311   : > { %v1693_v35 = vsub.f32 %v2970_v27, %v1608_v24  ;;  %v1886_v49 = vand.u32 2147483647, %v1694_v22 }
 0x312   : > { %v1762_v21 = vpop.permute.xlu0 %1761 }
 0x313   : > { %v1850_v31 = vadd.f32 %v3068_v60, %v1762_v21  ;;  %v1885_v12 = vand.u32 2147483647, %v1693_v35 }
 0x314   : > { %v1760_v43 = vpop.permute.xlu1 %1759 }
 0x315   : > { %v1914_v10 = vand.u32 2147483647, %v1850_v31  ;;  %v1849_v41 = vadd.f32 %v3052_v56, %v1760_v43 }
 0x316   : > { %v1770_v15 = vpop.permute.xlu0 %1769 }
 0x317   : > { %v1946_v54 = vadd.f32 %v1914_v10, %v1882_v11  ;;  %v1913_v19 = vand.u32 2147483647, %v1849_v41  ;;  %v1854_v63 = vadd.f32 %v2972_v28, %v1770_v15 }
 0x318   : > { %v1768_v58 = vpop.permute.xlu1 %1767 }
 0x319   : > { %v2009_v39 = vsel %vm285_vm0, %v1946_v54, 0.0  ;;  %v1945_v60 = vadd.f32 %v1913_v19, %v1881_v14  ;;  %v1918_v51 = vand.u32 2147483647, %v1854_v63  ;;  %v1853_v29 = vadd.f32 %v2968_v26, %v1768_v58 }
 0x31a   : > { %v2010_v25 = vadd.f32 %v2009_v39, %v2008_v17  ;;  %v1614_v56 = vpop.permute.xlu0 %1613 }
 0x31b   : > { %v1978_v9 = vsel %vm285_vm0, %v1945_v60, 0.0  ;;  %v1950_v27 = vadd.f32 %v1918_v51, %v1886_v49  ;;  %v1917_v47 = vand.u32 2147483647, %v1853_v29 }
 0x31c   : > { %v1979_v16 = vadd.f32 %v1978_v9, %v1977_v23  ;;  %v2012_v6 = vadd.f32 %v2011_v37, %v2010_v25  ;;  %v1612_v28 = vpop.permute.xlu1 %1611  ;;  %v1696_v25 = vsub.f32 %v2992_v36, %v1614_v56 }
 0x31d   : > { %v2013_v24 = vsel %vm285_vm0, %v1950_v27, 0.0  ;;  %v1949_v20 = vadd.f32 %v1917_v47, %v1885_v12  ;;  %v1695_v9 = vsub.f32 %v2982_v32, %v1612_v28 }
 0x31e   : > { %v3253_v7 = vadd.f32 %v2013_v24, %v2012_v6  ;;  %v1981_v26 = vadd.f32 %v1980_v33, %v1979_v16  ;;  %v1774_v21 = vpop.permute.xlu0 %1773 }
 0x31f   : > { %v1982_v17 = vsel %vm285_vm0, %v1949_v20, 0.0  ;;  %v1856_v51 = vadd.f32 %v2988_v34, %v1774_v21  ;;  %v1887_v56 = vand.u32 2147483647, %v1695_v9 }
 0x320   : > { %v3256_v45 = vadd.f32 %v1982_v17, %v1981_v26  ;;  %v1772_v31 = vpop.permute.xlu1 %1771  ;;  %v1888_v26 = vand.u32 2147483647, %v1696_v25 }
 0x321   : > { %v1855_v37 = vadd.f32 %v2976_v30, %v1772_v31  ;;  %v1920_v16 = vand.u32 2147483647, %v1856_v51 }
 0x322   : > { %v1618_v22 = vpop.permute.xlu0 %1617 }
 0x323   : > { %v1919_v33 = vand.u32 2147483647, %v1855_v37  ;;  %v1698_v24 = vsub.f32 %v3014_v44, %v1618_v22 }
 0x324   : > { %v1616_v43 = vpop.permute.xlu1 %1615 }
 0x325   : > { %v1697_v34 = vsub.f32 %v3004_v40, %v1616_v43  ;;  %v1951_v44 = vadd.f32 %v1919_v33, %v1887_v56  ;;  %v1890_v31 = vand.u32 2147483647, %v1698_v24 }
 0x326   : > { %v1778_v11 = vpop.permute.xlu0 %1777 }
 0x327   : > { %v1858_v27 = vadd.f32 %v3010_v42, %v1778_v11  ;;  %v1889_v40 = vand.u32 2147483647, %v1697_v34  ;;  %v1984_v51 = vsel %vm285_vm0, %v1951_v44, 0.0 }
 0x328   : > { %v1776_v23 = vpop.permute.xlu1 %1775 }
 0x329   : > { %v1857_v47 = vadd.f32 %v3000_v38, %v1776_v23  ;;  %v1922_v32 = vand.u32 2147483647, %v1858_v27  ;;  %v1952_v38 = vadd.f32 %v1920_v16, %v1888_v26  ;;  %v1985_v16 = vadd.f32 %v1984_v51, %v3256_v45 }
 0x32a   : > { %v1622_v10 = vpop.permute.xlu0 %1621 }
 0x32b   : > { %v1921_v28 = vand.u32 2147483647, %v1857_v47  ;;  %v1700_v42 = vsub.f32 %v3038_v52, %v1622_v10  ;;  %v1954_v11 = vadd.f32 %v1922_v32, %v1890_v31  ;;  %v2015_v52 = vsel %vm285_vm0, %v1952_v38, 0.0 }
 0x32c   : > { %v1620_v41 = vpop.permute.xlu1 %1619 }
 0x32d   : > { %v1699_v21 = vsub.f32 %v3026_v48, %v1620_v41  ;;  %v1953_v23 = vadd.f32 %v1921_v28, %v1889_v40  ;;  %v2017_v47 = vsel %vm285_vm0, %v1954_v11, 0.0 }
 0x32e   : > { %v1782_v14 = vpop.permute.xlu0 %1781 }
 0x32f   : > { %v1860_v20 = vadd.f32 %v3032_v50, %v1782_v14  ;;  %v1892_v14 = vand.u32 2147483647, %v1700_v42  ;;  %v1891_v10 = vand.u32 2147483647, %v1699_v21 }
 0x330   : > { %v1780_v18 = vpop.permute.xlu1 %1779 }
 0x331   : > { %v1859_v30 = vadd.f32 %v3022_v46, %v1780_v18  ;;  %v1924_v22 = vand.u32 2147483647, %v1860_v20 }
 0x332   : > { %v1626_v15 = vpop.permute.xlu0 %1625 }
 0x333   : > { %v1923_v50 = vand.u32 2147483647, %v1859_v30  ;;  %v1702_v48 = vsub.f32 %v3064_v59, %v1626_v15  ;;  %v1956_v37 = vadd.f32 %v1924_v22, %v1892_v14  ;;  %v2016_v15 = vadd.f32 %v2015_v52, %v3253_v7  ;;  %v3410_v52 = vld [vmem:[#allocation15_spill] sm:$0xff] }
 0x334   : > { %v3258_v35 = vpop.permute.xlu1 %1623 }
 0x335   : > { %v1701_v25 = vsub.f32 %v3048_v55, %v3258_v35  ;;  %v1894_v33 = vand.u32 2147483647, %v1702_v48  ;;  %v2019_v55 = vsel %vm285_vm0, %v1956_v37, 0.0  ;;  %v2018_v34 = vadd.f32 %v2017_v47, %v2016_v15  ;;  %v3411_v37 = vld [vmem:[#allocation13_spill] sm:$0xff]  ;;  %v3412_v47 = vld [vmem:[#allocation19_spill] sm:$0xff] }
 0x336   : > { %v1786_v54 = vpop.permute.xlu0 %1785 }
 0x337   : > { %v1862_v43 = vadd.f32 %v3056_v57, %v1786_v54  ;;  %v1955_v54 = vadd.f32 %v1923_v50, %v1891_v10  ;;  %v3407_v50 = vld [vmem:[#allocation14_spill] sm:$0xff] }
 0x338   : > { %v1784_v19 = vpop.permute.xlu1 %1783 }
 0x339   : > { %v1861_v18 = vadd.f32 %v3042_v53, %v1784_v19  ;;  %v1926_v9 = vand.u32 2147483647, %v1862_v43  ;;  %v1986_v53 = vsel %vm285_vm0, %v1953_v23, 0.0  ;;  %v1988_v26 = vsel %vm285_vm0, %v1955_v54, 0.0  ;;  %v3409_v23 = vld [vmem:[#allocation12_spill] sm:$0xff] }
 0x33a   : > { %v3260_v63 = vpop.permute.xlu0 %1629  ;;  %v1987_v20 = vadd.f32 %v1986_v53, %v1985_v16  ;;  %v3413_v53 = vld [vmem:[#allocation18_spill] sm:$0xff] }
 0x33b   : > { %v1925_v19 = vand.u32 2147483647, %v1861_v18  ;;  %v1704_v59 = vsub.f32 %v3092_v1, %v3260_v63  ;;  %v1958_v30 = vadd.f32 %v1926_v9, %v1894_v33  ;;  %v2020_v63 = vadd.f32 %v2019_v55, %v2018_v34  ;;  %v3415_v34 = vld [vmem:[#allocation16_spill] sm:$0xff] }
 0x33c   : > { %v3262_v49 = vpop.permute.xlu1 %1627 }
 0x33d   : > { %v1896_v1 = vand.u32 2147483647, %v1704_v59  ;;  %v1703_v7 = vsub.f32 %v3078_v62, %v3262_v49  ;;  %v2021_v31 = vsel %vm285_vm0, %v1958_v30, 0.0  ;;  %v3405_v62 = vld [vmem:[#allocation11_spill] sm:$0xff]  ;;  %v3406_v49 = vld [vmem:[#allocation9_spill] sm:$0xff] }
 0x33e   : > { %v1790_v58 = vpop.permute.xlu0 %1789 }
 0x33f   : > { %v1864_v57 = vadd.f32 %v3086_v0, %v1790_v58  ;;  %v1893_v0 = vand.u32 2147483647, %v1701_v25 }
 0x340   : > { %v1788_v39 = vpop.permute.xlu1 %1787 }
 0x341   : > { %v1928_v35 = vand.u32 2147483647, %v1864_v57  ;;  %v1863_v58 = vadd.f32 %v3072_v61, %v1788_v39  ;;  %v1957_v32 = vadd.f32 %v1925_v19, %v1893_v0  ;;  %v1989_v61 = vadd.f32 %v1988_v26, %v1987_v20 }
 0x342   : > { %v3264_v60 = vpop.permute.xlu0 %1633  ;;  %v2022_v26 = vadd.f32 %v2021_v31, %v2020_v63  ;;  %v3416_v31 = vld [vmem:[#allocation22_spill] sm:$0xff] }
 0x343   : > { %v1960_v39 = vadd.f32 %v1928_v35, %v1896_v1  ;;  %v1927_v21 = vand.u32 2147483647, %v1863_v58  ;;  %v1706_v44 = vsub.f32 %v3116_v5, %v3264_v60  ;;  %v3408_v5 = vld [vmem:[#allocation10_spill] sm:$0xff]  ;;  %v3414_v35 = vld [vmem:[#allocation17_spill] sm:$0xff] }
 0x344   : > { %v3267_v29 = vpop.permute.xlu1 %1631 }
 0x345   : > { %v1705_v40 = vsub.f32 %v3104_v3, %v3267_v29  ;;  %v2023_v29 = vsel %vm285_vm0, %v1960_v39, 0.0  ;;  %v1898_v18 = vand.u32 2147483647, %v1706_v44 }
 0x346   : > { %v1794_v12 = vpop.permute.xlu0 %1793 }
 0x347   : > { %v1866_v45 = vadd.f32 %v3110_v4, %v1794_v12  ;;  %v1897_v48 = vand.u32 2147483647, %v1705_v40 }
 0x348   : > { %v1792_v6 = vpop.permute.xlu1 %1791 }
 0x349   : > { %v1865_v28 = vadd.f32 %v3098_v2, %v1792_v6  ;;  %v1895_v6 = vand.u32 2147483647, %v1703_v7  ;;  %v1930_v22 = vand.u32 2147483647, %v1866_v45 }
 0x34a   : > { %v3278_v36 = vpop.permute.xlu0 %1637 }
 0x34b   : > { %v1708_v4 = vsub.f32 %v3405_v62, %v3278_v36  ;;  %v1959_v36 = vadd.f32 %v1927_v21, %v1895_v6  ;;  %v1962_v54 = vadd.f32 %v1930_v22, %v1898_v18 }
 0x34c   : > { %v3282_v17 = vpop.permute.xlu1 %1635 }
 0x34d   : > { %v1707_v60 = vsub.f32 %v3408_v5, %v3282_v17  ;;  %v2025_v1 = vsel %vm285_vm0, %v1962_v54, 0.0 }
 0x34e   : > { %v1798_v46 = vpop.permute.xlu0 %1797 }
 0x34f   : > { %v1868_v42 = vadd.f32 %v3132_v8, %v1798_v46  ;;  %v1990_v8 = vsel %vm285_vm0, %v1957_v32, 0.0  ;;  %v1929_v46 = vand.u32 2147483647, %v1865_v28  ;;  %v1899_v15 = vand.u32 2147483647, %v1707_v60 }
 0x350   : > { %v1796_v41 = vpop.permute.xlu1 %1795 }
 0x351   : > { %v1867_v12 = vadd.f32 %v3406_v49, %v1796_v41  ;;  %v1932_v11 = vand.u32 2147483647, %v1868_v42  ;;  %v1900_v41 = vand.u32 2147483647, %v1708_v4  ;;  %v1961_v59 = vadd.f32 %v1929_v46, %v1897_v48 }
 0x352   : > { %v1642_v27 = vpop.permute.xlu0 %1641  ;;  %v1991_v42 = vadd.f32 %v1990_v8, %v1989_v61  ;;  %v3417_v8 = vld [vmem:[#allocation21_spill] sm:$0xff] }
 0x353   : > { %v1710_v10 = vsub.f32 %v3410_v52, %v1642_v27  ;;  %v1931_v51 = vand.u32 2147483647, %v1867_v12  ;;  %v1964_v16 = vadd.f32 %v1932_v11, %v1900_v41  ;;  %v1994_v39 = vsel %vm285_vm0, %v1961_v59, 0.0 }
 0x354   : > { %v1640_v24 = vpop.permute.xlu1 %1639 }
 0x355   : > { %v1709_v25 = vsub.f32 %v3411_v37, %v1640_v24  ;;  %v1902_v0 = vand.u32 2147483647, %v1710_v10  ;;  %v1992_v24 = vsel %vm285_vm0, %v1959_v36, 0.0  ;;  %v1963_v30 = vadd.f32 %v1931_v51, %v1899_v15 }
 0x356   : > { %v1802_v56 = vpop.permute.xlu0 %1801  ;;  %v2027_v40 = vsel %vm285_vm0, %v1964_v16, 0.0  ;;  %v1993_v49 = vadd.f32 %v1992_v24, %v1991_v42 }
 0x357   : > { %v1870_v43 = vadd.f32 %v3407_v50, %v1802_v56  ;;  %v1901_v56 = vand.u32 2147483647, %v1709_v25  ;;  %v1972_v25 = vld [vmem:[#allocation2 + $0x8] sm:$0xff] }
 0x358   : > { %v1800_v38 = vpop.permute.xlu1 %1799  ;;  %v1995_v46 = vadd.f32 %v1994_v39, %v1993_v49 }
 0x359   : > { %v1869_v14 = vadd.f32 %v3409_v23, %v1800_v38  ;;  %v1934_v9 = vand.u32 2147483647, %v1870_v43  ;;  %v2024_v38 = vadd.f32 %v2023_v29, %v2022_v26  ;;  %v3418_v29 = vld [vmem:[#allocation20_spill] sm:$0xff] }
 0x35a   : > { %v1646_v2 = vpop.permute.xlu0 %1645 }
 0x35b   : > { %v1712_v17 = vsub.f32 %v3412_v47, %v1646_v2  ;;  %v1933_v33 = vand.u32 2147483647, %v1869_v14  ;;  %v1966_v7 = vadd.f32 %v1934_v9, %v1902_v0  ;;  %v2026_v12 = vadd.f32 %v2025_v1, %v2024_v38 }
 0x35c   : > { %v1644_v3 = vpop.permute.xlu1 %1643  ;;  %v1996_v2 = vsel %vm285_vm0, %v1963_v30, 0.0 }
 0x35d   : > { %v1711_v27 = vsub.f32 %v3414_v35, %v1644_v3  ;;  %v1904_v45 = vand.u32 2147483647, %v1712_v17  ;;  %v1965_v21 = vadd.f32 %v1933_v33, %v1901_v56  ;;  %v2029_v22 = vsel %vm285_vm0, %v1966_v7, 0.0  ;;  %v1971_v17 = vld [vmem:[#allocation2] sm:$0xff] }
 0x35e   : > { %v1806_v57 = vpop.permute.xlu0 %1805  ;;  %v2028_v5 = vadd.f32 %v2027_v40, %v2026_v12  ;;  %v1997_v18 = vadd.f32 %v1996_v2, %v1995_v46 }
 0x35f   : > { %v1872_v19 = vadd.f32 %v3413_v53, %v1806_v57  ;;  %v1903_v62 = vand.u32 2147483647, %v1711_v27  ;;  %v1998_v60 = vsel %vm285_vm0, %v1965_v21, 0.0 }
 0x360   : > { %v1804_v55 = vpop.permute.xlu1 %1803  ;;  %v2030_v52 = vadd.f32 %v2029_v22, %v2028_v5  ;;  %v1999_v51 = vadd.f32 %v1998_v60, %v1997_v18 }
 0x361   : > { %v1936_v58 = vand.u32 2147483647, %v1872_v19  ;;  %v1871_v20 = vadd.f32 %v3415_v34, %v1804_v55 }
 0x362   : > { %v1650_v32 = vpop.permute.xlu0 %1649 }
 0x363   : > { %v1935_v28 = vand.u32 2147483647, %v1871_v20  ;;  %v1968_v63 = vadd.f32 %v1936_v58, %v1904_v45  ;;  %v1714_v4 = vsub.f32 %v3416_v31, %v1650_v32 }
 0x364   : > { %v1648_v44 = vpop.permute.xlu1 %1647 }
 0x365   : > { %v1967_v50 = vadd.f32 %v1935_v28, %v1903_v62  ;;  %v1713_v61 = vsub.f32 %v3202_v13, %v1648_v44  ;;  %v2031_v23 = vsel %vm285_vm0, %v1968_v63, 0.0  ;;  %v1906_v14 = vand.u32 2147483647, %v1714_v4 }
 0x366   : > { %v1810_v6 = vpop.permute.xlu0 %1809  ;;  %v2032_v37 = vadd.f32 %v2031_v23, %v2030_v52 }
 0x367   : > { %v1874_v43 = vadd.f32 %v3417_v8, %v1810_v6  ;;  %v2000_v10 = vsel %vm285_vm0, %v1967_v50, 0.0  ;;  %v1905_v48 = vand.u32 2147483647, %v1713_v61 }
 0x368   : > { %v1808_v11 = vpop.permute.xlu1 %1807  ;;  %v2001_v9 = vadd.f32 %v2000_v10, %v1999_v51 }
 0x369   : > { %v1938_v3 = vand.u32 2147483647, %v1874_v43  ;;  %v1873_v36 = vadd.f32 %v3418_v29, %v1808_v11 }
 0x36b   : > { %v1970_v41 = vadd.f32 %v1938_v3, %v1906_v14  ;;  %v1937_v13 = vand.u32 2147483647, %v1873_v36 }
 0x36d   : > { %v2033_v57 = vsel %vm285_vm0, %v1970_v41, 0.0  ;;  %v1969_v54 = vadd.f32 %v1937_v13, %v1905_v48 }
 0x36e   : > { %v2034_v47 = vadd.f32 %v2033_v57, %v2032_v37 }
 0x36f   : > { %v2002_v53 = vsel %vm285_vm0, %v1969_v54, 0.0 }
 0x370   : > { %v2036_v19 = vadd.f32 %v2034_v47, %v1972_v25  ;;  %v2003_v59 = vadd.f32 %v2002_v53, %v2001_v9 }
 0x372   : > { %2038 = vst.msk [vmem:[#allocation2 + $0x8] sm:$0xff] %vm285_vm0, %v2036_v19  ;;  %v2035_v15 = vadd.f32 %v2003_v59, %v1971_v17 }
 0x374   : > { %2037 = vst.msk [vmem:[#allocation2] sm:$0xff] %vm285_vm0, %v2035_v15 }
 0x379   : > { %v2043_v16 = vld [vmem:[#allocation2 + $0x8] sm:$0xff] }
 0x37a   : > { %v2045_v0 = vsel %vm285_vm0, %v2043_v16, 0.0 }
 0x37b   : > { %v2042_v33 = vld [vmem:[#allocation2] sm:$0xff] }
 0x37c   : > { %v2044_v55 = vsel %vm285_vm0, %v2042_v33, 0.0 }
 0x37d   : > { %v2046_v35 = vadd.f32 %v2045_v0, %v2044_v55 }
 0x37f   : > { %2047 = vadd.xlane.f32.xlu1 %v2046_v35 }
 0x408   : > { %v2048_v27 = vpop.xlane.xlu1 %2047 }
 0x409   : > { %v2049_v58 = vrot.slane %v2048_v27, 4 }
 0x40b   : > { %v2050_v34 = vadd.f32 %v2049_v58, %v2048_v27 }
 0x40d   : > { %v2051_v20 = vrot.slane %v2050_v34, 2 }
 0x40f   : > { %v2052_v26 = vadd.f32 %v2051_v20, %v2050_v34 }
 0x411   : > { %v2053_v24 = vrot.slane %v2052_v26, 1 }
 0x413   : > { %v2054_v30 = vadd.f32 %v2053_v24, %v2052_v26 }
 0x415   : > { %2380 = vpush %v2054_v30 }
 0x446   : > { %s2381_s14 = spop %2380 }
 0x447   : > { %v2056_v56 = vstv %s2381_s14 }
 0x448   : > { %2057 = vst [vmem:[%s279_s13] sm:$0xff] %v2056_v56 }
 0x449 PF: > { %s20_s20 = sadd.s32 1, %s2702_s20   ;;  %s3419_s15 = smov %s2686_s16 }
 0x44a   : > { %p17_p9 = scmp.ge.s32.totalorder %s20_s20, 4   ;;  %s3420_s16 = smov %s2690_s17 }
 0x44b   : > { %s3421_s17 = smov %s2784_s27  ;;  %s3422_s18 = smov %s2698_s19 }
 0x44c   : > { %s3423_s19 = smov %s3425_s22  ;;  %19 = sbr.rel (!%p17_p9) target bundleno = 6 (0x6), region = 97 }
 0x451   :  { %2077 = vsyncpa [#allocation4], 1 }
 0x452   :  { %2079 = vsyncpa [#allocation4 + $0x1], 1 }
 0x453   :  { %2080 = vsyncpa [#allocation6], 1 }
 0x454   :  { %2082 = vsyncpa [#allocation6 + $0x1], 1 }

</bundles_post_ra>
